<compile_context>
chip_gen: v7x
topology: tpu7x:2x2x1
jax: 0.10.0
libtpu: 0.0.40
codegen_flags: <defaults>
</compile_context>

<pallas_src>
import functools
import math

import jax
import jax.numpy as jnp
from jax.experimental import pallas as pl
from jax.experimental.pallas import tpu as pltpu


# -------------------- config (scaled-down xlm-roberta-base) --------------------
VOCAB = 64
MAX_POS = 40
HIDDEN = 64
NUM_HEADS = 4
HEAD_DIM = HIDDEN // NUM_HEADS
INTERMEDIATE = 128
NUM_LAYERS = 2
N_CLASSES = 3
CLS_PAD = 128            # lane-dense padded classifier width (sliced to N_CLASSES in JAX)
LN_EPS = 1e-5
PAD_IDX = 1              # XLM-Roberta padding_idx (positions offset by it)
WEIGHT_DTYPE = jnp.bfloat16


# ------------------------------ fused Pallas kernel -----------------------------
def _roberta_fused_kernel(x_ref, mask_ref,
                          emb_g_ref, emb_b_ref,
                          w_qkv_ref, b_qkv_ref, wo_ref, bo_ref,
                          ln1_g_ref, ln1_b_ref, w1_ref, b1_ref,
                          w2_ref, b2_ref, ln2_g_ref, ln2_b_ref,
                          pre_w_ref, pre_b_ref, cls_w_ref, cls_b_ref,
                          out_ref, *, seq_len):
    S = seq_len
    scale = 1.0 / math.sqrt(HEAD_DIM)

    def ln(y, g, b):
        # residual is added by the caller; LN math in f32
        mu = jnp.mean(y, axis=-1, keepdims=True)
        var = jnp.mean((y - mu) * (y - mu), axis=-1, keepdims=True)
        return (y - mu) * jax.lax.rsqrt(var + LN_EPS) * g + b

    def mm(a, w):
        # bf16 MXU matmul with f32 accumulation
        return jnp.dot(a.astype(w.dtype), w, preferred_element_type=jnp.float32)

    # embeddings LayerNorm
    x = ln(x_ref[0], emb_g_ref[...], emb_b_ref[...])            # (S, H) f32

    # hoist the additive-mask broadcast once (reused across layers & heads)
    add_mask = jnp.broadcast_to(mask_ref[0], (S, S))            # (S, S)

    for l in range(NUM_LAYERS):
        # ---------------- self-attention (fused QKV) ----------------
        qkv = mm(x, w_qkv_ref[l]) + b_qkv_ref[l]                # (S, 3H)
        wo_l = wo_ref[l]                                        # (H, H) bf16
        attn = jnp.zeros((S, HIDDEN), jnp.float32)
        for h in range(NUM_HEADS):
            lo = h * HEAD_DIM
            qh = qkv[:, lo:lo + HEAD_DIM] * scale               # (S, Dh)
            kh = qkv[:, HIDDEN + lo:HIDDEN + lo + HEAD_DIM]
            vh = qkv[:, 2 * HIDDEN + lo:2 * HIDDEN + lo + HEAD_DIM]
            s = jax.lax.dot_general(qh, kh, (((1,), (1,)), ((), ())),
                                    preferred_element_type=jnp.float32)  # (S, S)
            s = s + add_mask
            m = jnp.max(s, axis=-1, keepdims=True)
            p = jnp.exp(s - m)
            p = p * pl.reciprocal(jnp.sum(p, axis=-1, keepdims=True), approx=True)
            ctx_h = jnp.dot(p, vh, preferred_element_type=jnp.float32)   # (S, Dh)
            # fold the per-head output projection directly (no concat / transpose)
            attn = attn + mm(ctx_h, wo_l[lo:lo + HEAD_DIM, :])
        attn = attn + bo_ref[l]
        x = ln(x + attn, ln1_g_ref[l], ln1_b_ref[l])            # residual fused into LN

        # ---------------- feed-forward (GELU) ----------------
        h1 = mm(x, w1_ref[l]) + b1_ref[l]                       # (S, I)
        # TODO(synk): HF XLM-Roberta uses erf-exact GELU; tanh approximation (~1e-3 dev).
        c = math.sqrt(2.0 / math.pi)
        h1 = 0.5 * h1 * (1.0 + jnp.tanh(c * (h1 + 0.044715 * h1 * h1 * h1)))
        ffn = mm(h1, w2_ref[l]) + b2_ref[l]
        x = ln(x + ffn, ln2_g_ref[l], ln2_b_ref[l])

    # --------- head: hidden[:, 0] -> Linear -> ReLU -> Dropout(id) -> Linear ---------
    pooled = x[0:1, :]                                          # (1, H)
    pooled = jnp.maximum(mm(pooled, pre_w_ref[...]) + pre_b_ref[...], 0.0)
    logits = mm(pooled, cls_w_ref[...]) + cls_b_ref[...]        # (1, CLS_PAD) lane-dense
    out_ref[0] = logits.astype(out_ref.dtype)


# ------------------------------ model (thin JAX glue) ----------------------------
def roberta_class_forward(params, input_ids, attention_mask):
    """Equivalent of RobertaClass.forward (inference mode: dropout = identity)."""
    B, S = input_ids.shape
    mask_i = attention_mask.astype(jnp.int32)
    # XLM-Roberta position ids: cumsum over non-pad tokens, offset by padding_idx
    position_ids = jnp.cumsum(mask_i, axis=1) * mask_i + PAD_IDX

    # TODO(synk): embedding-table gathers stay in JAX (tiny, data-dependent lookup).
    x = (params["word_emb"][input_ids]
         + params["pos_emb"][position_ids]
         + params["type_emb"][0]).astype(jnp.float32)                   # (B, S, H)
    add_mask = (1.0 - attention_mask.astype(jnp.float32))[:, None, :] * -1e9  # (B, 1, S)

    weight_names = ["emb_ln_g", "emb_ln_b",
                    "w_qkv", "b_qkv", "wo", "bo", "ln1_g", "ln1_b",
                    "w1", "b1", "w2", "b2", "ln2_g", "ln2_b",
                    "pre_w", "pre_b", "cls_w", "cls_b"]
    weights = [params[n] for n in weight_names]

    in_specs = [pl.BlockSpec((1, S, HIDDEN), lambda b: (b, 0, 0)),
                pl.BlockSpec((1, 1, S), lambda b: (b, 0, 0))]
    # whole weight arrays, VMEM-resident across the batch grid
    in_specs += [pl.BlockSpec(w.shape, lambda b, n=w.ndim: (0,) * n) for w in weights]

    out = pl.pallas_call(
        functools.partial(_roberta_fused_kernel, seq_len=S),
        out_shape=jax.ShapeDtypeStruct((B, 1, CLS_PAD), jnp.float32),
        grid=(B,),
        in_specs=in_specs,
        out_specs=pl.BlockSpec((1, 1, CLS_PAD), lambda b: (b, 0, 0)),
        compiler_params=pltpu.CompilerParams(dimension_semantics=("parallel",)),
    )(x, add_mask, *weights)

    return out[:, 0, :N_CLASSES]


# ------------------------------ deterministic params ----------------------------
def init_params(key):
    std = 0.02
    keys = iter(jax.random.split(key, 64))

    def nrm(shape):
        return jax.random.normal(next(keys), shape, dtype=jnp.float32) * std

    L, H, I = NUM_LAYERS, HIDDEN, INTERMEDIATE
    params = {
        "word_emb": nrm((VOCAB, H)),
        "pos_emb": nrm((MAX_POS, H)),
        "type_emb": nrm((1, H)),
        "emb_ln_g": jnp.ones((1, H), jnp.float32),
        "emb_ln_b": jnp.zeros((1, H), jnp.float32),
        # per-layer weights stacked on a leading axis; Q|K|V fused along the output dim
        "w_qkv": jnp.concatenate(
            [nrm((L, H, H)), nrm((L, H, H)), nrm((L, H, H))], axis=-1
        ).astype(WEIGHT_DTYPE),                                   # (L, H, 3H)
        "b_qkv": jnp.zeros((L, 1, 3 * H), jnp.float32),
        "wo": nrm((L, H, H)).astype(WEIGHT_DTYPE),
        "bo": jnp.zeros((L, 1, H), jnp.float32),
        "ln1_g": jnp.ones((L, 1, H), jnp.float32),
        "ln1_b": jnp.zeros((L, 1, H), jnp.float32),
        "w1": nrm((L, H, I)).astype(WEIGHT_DTYPE),
        "b1": jnp.zeros((L, 1, I), jnp.float32),
        "w2": nrm((L, I, H)).astype(WEIGHT_DTYPE),
        "b2": jnp.zeros((L, 1, H), jnp.float32),
        "ln2_g": jnp.ones((L, 1, H), jnp.float32),
        "ln2_b": jnp.zeros((L, 1, H), jnp.float32),
        "pre_w": nrm((H, H)).astype(WEIGHT_DTYPE),
        "pre_b": jnp.zeros((1, H), jnp.float32),
        # classifier padded to 128 lanes (lane-dense store); real logits = cols [:N_CLASSES]
        "cls_w": jnp.pad(nrm((H, N_CLASSES)),
                         ((0, 0), (0, CLS_PAD - N_CLASSES))).astype(WEIGHT_DTYPE),
        "cls_b": jnp.zeros((1, CLS_PAD), jnp.float32),
    }
    return params


# ------------------------------------ main --------------------------------------
if __name__ == "__main__":
    B, S = 2, 8
    key = jax.random.PRNGKey(0)
    pkey, ikey = jax.random.split(key)

    params = init_params(pkey)
    input_ids = jax.random.randint(ikey, (B, S), 2, VOCAB, dtype=jnp.int32)
    # second example has 2 padding tokens at the end
    attention_mask = jnp.array([[1] * S, [1] * (S - 2) + [0] * 2], dtype=jnp.int32)
    input_ids = jnp.where(attention_mask == 1, input_ids, PAD_IDX)

    forward = jax.jit(roberta_class_forward)
    logits = forward(params, input_ids, attention_mask)
    logits = jax.block_until_ready(logits)
    assert logits.shape == (B, N_CLASSES) and logits.dtype == jnp.float32
    print("KERNEL_OK")
</pallas_src>

<mosaic_0001>
module attributes {stable_mosaic.version = 11 : i64} {
  func.func @_roberta_fused_kernel(%arg0: i32, %arg1: memref<1x8x64xf32, #tpu.memory_space<vmem>>, %arg2: memref<1x1x8xf32, #tpu.memory_space<vmem>>, %arg3: memref<1x64xf32, #tpu.memory_space<vmem>>, %arg4: memref<1x64xf32, #tpu.memory_space<vmem>>, %arg5: memref<2x64x192xbf16, #tpu.memory_space<vmem>>, %arg6: memref<2x1x192xf32, #tpu.memory_space<vmem>>, %arg7: memref<2x64x64xbf16, #tpu.memory_space<vmem>>, %arg8: memref<2x1x64xf32, #tpu.memory_space<vmem>>, %arg9: memref<2x1x64xf32, #tpu.memory_space<vmem>>, %arg10: memref<2x1x64xf32, #tpu.memory_space<vmem>>, %arg11: memref<2x64x128xbf16, #tpu.memory_space<vmem>>, %arg12: memref<2x1x128xf32, #tpu.memory_space<vmem>>, %arg13: memref<2x128x64xbf16, #tpu.memory_space<vmem>>, %arg14: memref<2x1x64xf32, #tpu.memory_space<vmem>>, %arg15: memref<2x1x64xf32, #tpu.memory_space<vmem>>, %arg16: memref<2x1x64xf32, #tpu.memory_space<vmem>>, %arg17: memref<64x64xbf16, #tpu.memory_space<vmem>>, %arg18: memref<1x64xf32, #tpu.memory_space<vmem>>, %arg19: memref<64x128xbf16, #tpu.memory_space<vmem>>, %arg20: memref<1x128xf32, #tpu.memory_space<vmem>>, %arg21: memref<1x1x128xf32, #tpu.memory_space<vmem>>) attributes {dimension_semantics = [#tpu.dimension_semantics<parallel>], iteration_bounds = array<i64: 2>, scalar_prefetch = 0 : i64, scratch_operands = 0 : i64, tpu.core_type = #tpu.core_type<tc>, window_params = [{transform_indices = @transform_0, window_bounds = array<i64: 1, 8, 64>}, {transform_indices = @transform_1, window_bounds = array<i64: 1, 1, 8>}, {pipeline_mode = #tpu.pipeline_mode<synchronous>, transform_indices = @transform_2, window_bounds = array<i64: 1, 64>}, {pipeline_mode = #tpu.pipeline_mode<synchronous>, transform_indices = @transform_3, window_bounds = array<i64: 1, 64>}, {pipeline_mode = #tpu.pipeline_mode<synchronous>, transform_indices = @transform_4, window_bounds = array<i64: 2, 64, 192>}, {pipeline_mode = #tpu.pipeline_mode<synchronous>, transform_indices = @transform_5, window_bounds = array<i64: 2, 1, 192>}, {pipeline_mode = #tpu.pipeline_mode<synchronous>, transform_indices = @transform_6, window_bounds = array<i64: 2, 64, 64>}, {pipeline_mode = #tpu.pipeline_mode<synchronous>, transform_indices = @transform_7, window_bounds = array<i64: 2, 1, 64>}, {pipeline_mode = #tpu.pipeline_mode<synchronous>, transform_indices = @transform_8, window_bounds = array<i64: 2, 1, 64>}, {pipeline_mode = #tpu.pipeline_mode<synchronous>, transform_indices = @transform_9, window_bounds = array<i64: 2, 1, 64>}, {pipeline_mode = #tpu.pipeline_mode<synchronous>, transform_indices = @transform_10, window_bounds = array<i64: 2, 64, 128>}, {pipeline_mode = #tpu.pipeline_mode<synchronous>, transform_indices = @transform_11, window_bounds = array<i64: 2, 1, 128>}, {pipeline_mode = #tpu.pipeline_mode<synchronous>, transform_indices = @transform_12, window_bounds = array<i64: 2, 128, 64>}, {pipeline_mode = #tpu.pipeline_mode<synchronous>, transform_indices = @transform_13, window_bounds = array<i64: 2, 1, 64>}, {pipeline_mode = #tpu.pipeline_mode<synchronous>, transform_indices = @transform_14, window_bounds = array<i64: 2, 1, 64>}, {pipeline_mode = #tpu.pipeline_mode<synchronous>, transform_indices = @transform_15, window_bounds = array<i64: 2, 1, 64>}, {pipeline_mode = #tpu.pipeline_mode<synchronous>, transform_indices = @transform_16, window_bounds = array<i64: 64, 64>}, {pipeline_mode = #tpu.pipeline_mode<synchronous>, transform_indices = @transform_17, window_bounds = array<i64: 1, 64>}, {pipeline_mode = #tpu.pipeline_mode<synchronous>, transform_indices = @transform_18, window_bounds = array<i64: 64, 128>}, {pipeline_mode = #tpu.pipeline_mode<synchronous>, transform_indices = @transform_19, window_bounds = array<i64: 1, 128>}, {transform_indices = @transform_20, window_bounds = array<i64: 1, 1, 128>}]} {
    %c0 = arith.constant 0 : index
    %c0_0 = arith.constant 0 : index
    %c0_1 = arith.constant 0 : index
    %0 = vector.load %arg1[%c0, %c0_0, %c0_1] : memref<1x8x64xf32, #tpu.memory_space<vmem>>, vector<1x8x64xf32>
    %1 = vector.shape_cast %0 : vector<1x8x64xf32> to vector<8x64xf32>
    %c0_2 = arith.constant 0 : index
    %c0_3 = arith.constant 0 : index
    %2 = vector.load %arg3[%c0_2, %c0_3] : memref<1x64xf32, #tpu.memory_space<vmem>>, vector<1x64xf32>
    %c0_4 = arith.constant 0 : index
    %c0_5 = arith.constant 0 : index
    %3 = vector.load %arg4[%c0_4, %c0_5] : memref<1x64xf32, #tpu.memory_space<vmem>>, vector<1x64xf32>
    %cst = arith.constant dense<0.000000e+00> : vector<8xf32>
    %4 = vector.multi_reduction <add>, %1, %cst [1] : vector<8x64xf32> to vector<8xf32>
    %5 = vector.shape_cast %4 : vector<8xf32> to vector<8x1xf32>
    %cst_6 = arith.constant 6.400000e+01 : f32
    %6 = vector.broadcast %cst_6 : f32 to vector<8x1xf32>
    %7 = arith.divf %5, %6 : vector<8x1xf32>
    %8 = vector.broadcast %7 : vector<8x1xf32> to vector<8x64xf32>
    %9 = arith.subf %1, %8 : vector<8x64xf32>
    %10 = vector.broadcast %7 : vector<8x1xf32> to vector<8x64xf32>
    %11 = arith.subf %1, %10 : vector<8x64xf32>
    %12 = arith.mulf %9, %11 : vector<8x64xf32>
    %cst_7 = arith.constant dense<0.000000e+00> : vector<8xf32>
    %13 = vector.multi_reduction <add>, %12, %cst_7 [1] : vector<8x64xf32> to vector<8xf32>
    %14 = vector.shape_cast %13 : vector<8xf32> to vector<8x1xf32>
    %cst_8 = arith.constant 6.400000e+01 : f32
    %15 = vector.broadcast %cst_8 : f32 to vector<8x1xf32>
    %16 = arith.divf %14, %15 : vector<8x1xf32>
    %17 = vector.broadcast %7 : vector<8x1xf32> to vector<8x64xf32>
    %18 = arith.subf %1, %17 : vector<8x64xf32>
    %cst_9 = arith.constant 9.99999974E-6 : f32
    %19 = vector.broadcast %cst_9 : f32 to vector<8x1xf32>
    %20 = arith.addf %16, %19 : vector<8x1xf32>
    %21 = math.rsqrt %20 : vector<8x1xf32>
    %22 = vector.broadcast %21 : vector<8x1xf32> to vector<8x64xf32>
    %23 = arith.mulf %18, %22 : vector<8x64xf32>
    %24 = vector.broadcast %2 : vector<1x64xf32> to vector<8x64xf32>
    %25 = arith.mulf %23, %24 : vector<8x64xf32>
    %26 = vector.broadcast %3 : vector<1x64xf32> to vector<8x64xf32>
    %27 = arith.addf %25, %26 : vector<8x64xf32>
    %c0_10 = arith.constant 0 : index
    %c0_11 = arith.constant 0 : index
    %c0_12 = arith.constant 0 : index
    %28 = vector.load %arg2[%c0_10, %c0_11, %c0_12] : memref<1x1x8xf32, #tpu.memory_space<vmem>>, vector<1x1x8xf32>
    %29 = vector.shape_cast %28 : vector<1x1x8xf32> to vector<1x8xf32>
    %30 = vector.shape_cast %29 : vector<1x8xf32> to vector<1x8xf32>
    %31 = vector.broadcast %30 : vector<1x8xf32> to vector<8x8xf32>
    %c0_13 = arith.constant 0 : index
    %c0_14 = arith.constant 0 : index
    %c0_15 = arith.constant 0 : index
    %32 = vector.load %arg5[%c0_13, %c0_14, %c0_15] : memref<2x64x192xbf16, #tpu.memory_space<vmem>>, vector<1x64x192xbf16>
    %33 = vector.shape_cast %32 : vector<1x64x192xbf16> to vector<64x192xbf16>
    %34 = arith.truncf %27 : vector<8x64xf32> to vector<8x64xbf16>
    %cst_16 = arith.constant dense<0.000000e+00> : vector<8x192xf32>
    %35 = tpu.matmul %34, %33, %cst_16 {dimension_numbers = #tpu.dot_dimension_numbers<[1], [0], [0], [1], [0, 0, 1, 1], [], []>} : vector<8x64xbf16>, vector<64x192xbf16>, vector<8x192xf32> -> vector<8x192xf32>
    %c0_17 = arith.constant 0 : index
    %c0_18 = arith.constant 0 : index
    %c0_19 = arith.constant 0 : index
    %36 = vector.load %arg6[%c0_17, %c0_18, %c0_19] : memref<2x1x192xf32, #tpu.memory_space<vmem>>, vector<1x1x192xf32>
    %37 = vector.shape_cast %36 : vector<1x1x192xf32> to vector<1x192xf32>
    %38 = vector.broadcast %37 : vector<1x192xf32> to vector<8x192xf32>
    %39 = arith.addf %35, %38 : vector<8x192xf32>
    %c0_20 = arith.constant 0 : index
    %c0_21 = arith.constant 0 : index
    %c0_22 = arith.constant 0 : index
    %40 = vector.load %arg7[%c0_20, %c0_21, %c0_22] : memref<2x64x64xbf16, #tpu.memory_space<vmem>>, vector<1x64x64xbf16>
    %41 = vector.shape_cast %40 : vector<1x64x64xbf16> to vector<64x64xbf16>
    %cst_23 = arith.constant 0.000000e+00 : f32
    %42 = vector.broadcast %cst_23 : f32 to vector<8x64xf32>
    %43 = vector.extract_strided_slice %39 {offsets = [0, 0], sizes = [8, 16], strides = [1, 1]} : vector<8x192xf32> to vector<8x16xf32>
    %cst_24 = arith.constant 2.500000e-01 : f32
    %44 = vector.broadcast %cst_24 : f32 to vector<8x16xf32>
    %45 = arith.mulf %43, %44 : vector<8x16xf32>
    %46 = vector.extract_strided_slice %39 {offsets = [0, 64], sizes = [8, 16], strides = [1, 1]} : vector<8x192xf32> to vector<8x16xf32>
    %47 = vector.extract_strided_slice %39 {offsets = [0, 128], sizes = [8, 16], strides = [1, 1]} : vector<8x192xf32> to vector<8x16xf32>
    %cst_25 = arith.constant dense<0.000000e+00> : vector<8x8xf32>
    %48 = tpu.matmul %45, %46, %cst_25 {dimension_numbers = #tpu.dot_dimension_numbers<[1], [1], [0], [0], [0, 0, 1, 0], [], []>} : vector<8x16xf32>, vector<8x16xf32>, vector<8x8xf32> -> vector<8x8xf32>
    %49 = arith.addf %48, %31 : vector<8x8xf32>
    %cst_26 = arith.constant dense<0xFF800000> : vector<8xf32>
    %50 = vector.multi_reduction <maximumf>, %49, %cst_26 [1] : vector<8x8xf32> to vector<8xf32>
    %51 = vector.shape_cast %50 : vector<8xf32> to vector<8x1xf32>
    %52 = vector.broadcast %51 : vector<8x1xf32> to vector<8x8xf32>
    %53 = arith.subf %49, %52 : vector<8x8xf32>
    %54 = math.exp %53 : vector<8x8xf32>
    %cst_27 = arith.constant dense<0.000000e+00> : vector<8xf32>
    %55 = vector.multi_reduction <add>, %54, %cst_27 [1] : vector<8x8xf32> to vector<8xf32>
    %56 = vector.shape_cast %55 : vector<8xf32> to vector<8x1xf32>
    %57 = tpu.reciprocal %56 {approx = true} : vector<8x1xf32> -> vector<8x1xf32>
    %58 = vector.broadcast %57 : vector<8x1xf32> to vector<8x8xf32>
    %59 = arith.mulf %54, %58 : vector<8x8xf32>
    %cst_28 = arith.constant dense<0.000000e+00> : vector<8x16xf32>
    %60 = tpu.matmul %59, %47, %cst_28 {dimension_numbers = #tpu.dot_dimension_numbers<[1], [0], [0], [1], [0, 0, 1, 1], [], []>} : vector<8x8xf32>, vector<8x16xf32>, vector<8x16xf32> -> vector<8x16xf32>
    %61 = vector.extract_strided_slice %41 {offsets = [0, 0], sizes = [16, 64], strides = [1, 1]} : vector<64x64xbf16> to vector<16x64xbf16>
    %62 = arith.truncf %60 : vector<8x16xf32> to vector<8x16xbf16>
    %cst_29 = arith.constant dense<0.000000e+00> : vector<8x64xf32>
    %63 = tpu.matmul %62, %61, %cst_29 {dimension_numbers = #tpu.dot_dimension_numbers<[1], [0], [0], [1], [0, 0, 1, 1], [], []>} : vector<8x16xbf16>, vector<16x64xbf16>, vector<8x64xf32> -> vector<8x64xf32>
    %64 = arith.addf %42, %63 : vector<8x64xf32>
    %65 = vector.extract_strided_slice %39 {offsets = [0, 16], sizes = [8, 16], strides = [1, 1]} : vector<8x192xf32> to vector<8x16xf32>
    %cst_30 = arith.constant 2.500000e-01 : f32
    %66 = vector.broadcast %cst_30 : f32 to vector<8x16xf32>
    %67 = arith.mulf %65, %66 : vector<8x16xf32>
    %68 = vector.extract_strided_slice %39 {offsets = [0, 80], sizes = [8, 16], strides = [1, 1]} : vector<8x192xf32> to vector<8x16xf32>
    %69 = vector.extract_strided_slice %39 {offsets = [0, 144], sizes = [8, 16], strides = [1, 1]} : vector<8x192xf32> to vector<8x16xf32>
    %cst_31 = arith.constant dense<0.000000e+00> : vector<8x8xf32>
    %70 = tpu.matmul %67, %68, %cst_31 {dimension_numbers = #tpu.dot_dimension_numbers<[1], [1], [0], [0], [0, 0, 1, 0], [], []>} : vector<8x16xf32>, vector<8x16xf32>, vector<8x8xf32> -> vector<8x8xf32>
    %71 = arith.addf %70, %31 : vector<8x8xf32>
    %cst_32 = arith.constant dense<0xFF800000> : vector<8xf32>
    %72 = vector.multi_reduction <maximumf>, %71, %cst_32 [1] : vector<8x8xf32> to vector<8xf32>
    %73 = vector.shape_cast %72 : vector<8xf32> to vector<8x1xf32>
    %74 = vector.broadcast %73 : vector<8x1xf32> to vector<8x8xf32>
    %75 = arith.subf %71, %74 : vector<8x8xf32>
    %76 = math.exp %75 : vector<8x8xf32>
    %cst_33 = arith.constant dense<0.000000e+00> : vector<8xf32>
    %77 = vector.multi_reduction <add>, %76, %cst_33 [1] : vector<8x8xf32> to vector<8xf32>
    %78 = vector.shape_cast %77 : vector<8xf32> to vector<8x1xf32>
    %79 = tpu.reciprocal %78 {approx = true} : vector<8x1xf32> -> vector<8x1xf32>
    %80 = vector.broadcast %79 : vector<8x1xf32> to vector<8x8xf32>
    %81 = arith.mulf %76, %80 : vector<8x8xf32>
    %cst_34 = arith.constant dense<0.000000e+00> : vector<8x16xf32>
    %82 = tpu.matmul %81, %69, %cst_34 {dimension_numbers = #tpu.dot_dimension_numbers<[1], [0], [0], [1], [0, 0, 1, 1], [], []>} : vector<8x8xf32>, vector<8x16xf32>, vector<8x16xf32> -> vector<8x16xf32>
    %83 = vector.extract_strided_slice %41 {offsets = [16, 0], sizes = [16, 64], strides = [1, 1]} : vector<64x64xbf16> to vector<16x64xbf16>
    %84 = arith.truncf %82 : vector<8x16xf32> to vector<8x16xbf16>
    %cst_35 = arith.constant dense<0.000000e+00> : vector<8x64xf32>
    %85 = tpu.matmul %84, %83, %cst_35 {dimension_numbers = #tpu.dot_dimension_numbers<[1], [0], [0], [1], [0, 0, 1, 1], [], []>} : vector<8x16xbf16>, vector<16x64xbf16>, vector<8x64xf32> -> vector<8x64xf32>
    %86 = arith.addf %64, %85 : vector<8x64xf32>
    %87 = vector.extract_strided_slice %39 {offsets = [0, 32], sizes = [8, 16], strides = [1, 1]} : vector<8x192xf32> to vector<8x16xf32>
    %cst_36 = arith.constant 2.500000e-01 : f32
    %88 = vector.broadcast %cst_36 : f32 to vector<8x16xf32>
    %89 = arith.mulf %87, %88 : vector<8x16xf32>
    %90 = vector.extract_strided_slice %39 {offsets = [0, 96], sizes = [8, 16], strides = [1, 1]} : vector<8x192xf32> to vector<8x16xf32>
    %91 = vector.extract_strided_slice %39 {offsets = [0, 160], sizes = [8, 16], strides = [1, 1]} : vector<8x192xf32> to vector<8x16xf32>
    %cst_37 = arith.constant dense<0.000000e+00> : vector<8x8xf32>
    %92 = tpu.matmul %89, %90, %cst_37 {dimension_numbers = #tpu.dot_dimension_numbers<[1], [1], [0], [0], [0, 0, 1, 0], [], []>} : vector<8x16xf32>, vector<8x16xf32>, vector<8x8xf32> -> vector<8x8xf32>
    %93 = arith.addf %92, %31 : vector<8x8xf32>
    %cst_38 = arith.constant dense<0xFF800000> : vector<8xf32>
    %94 = vector.multi_reduction <maximumf>, %93, %cst_38 [1] : vector<8x8xf32> to vector<8xf32>
    %95 = vector.shape_cast %94 : vector<8xf32> to vector<8x1xf32>
    %96 = vector.broadcast %95 : vector<8x1xf32> to vector<8x8xf32>
    %97 = arith.subf %93, %96 : vector<8x8xf32>
    %98 = math.exp %97 : vector<8x8xf32>
    %cst_39 = arith.constant dense<0.000000e+00> : vector<8xf32>
    %99 = vector.multi_reduction <add>, %98, %cst_39 [1] : vector<8x8xf32> to vector<8xf32>
    %100 = vector.shape_cast %99 : vector<8xf32> to vector<8x1xf32>
    %101 = tpu.reciprocal %100 {approx = true} : vector<8x1xf32> -> vector<8x1xf32>
    %102 = vector.broadcast %101 : vector<8x1xf32> to vector<8x8xf32>
    %103 = arith.mulf %98, %102 : vector<8x8xf32>
    %cst_40 = arith.constant dense<0.000000e+00> : vector<8x16xf32>
    %104 = tpu.matmul %103, %91, %cst_40 {dimension_numbers = #tpu.dot_dimension_numbers<[1], [0], [0], [1], [0, 0, 1, 1], [], []>} : vector<8x8xf32>, vector<8x16xf32>, vector<8x16xf32> -> vector<8x16xf32>
    %105 = vector.extract_strided_slice %41 {offsets = [32, 0], sizes = [16, 64], strides = [1, 1]} : vector<64x64xbf16> to vector<16x64xbf16>
    %106 = arith.truncf %104 : vector<8x16xf32> to vector<8x16xbf16>
    %cst_41 = arith.constant dense<0.000000e+00> : vector<8x64xf32>
    %107 = tpu.matmul %106, %105, %cst_41 {dimension_numbers = #tpu.dot_dimension_numbers<[1], [0], [0], [1], [0, 0, 1, 1], [], []>} : vector<8x16xbf16>, vector<16x64xbf16>, vector<8x64xf32> -> vector<8x64xf32>
    %108 = arith.addf %86, %107 : vector<8x64xf32>
    %109 = vector.extract_strided_slice %39 {offsets = [0, 48], sizes = [8, 16], strides = [1, 1]} : vector<8x192xf32> to vector<8x16xf32>
    %cst_42 = arith.constant 2.500000e-01 : f32
    %110 = vector.broadcast %cst_42 : f32 to vector<8x16xf32>
    %111 = arith.mulf %109, %110 : vector<8x16xf32>
    %112 = vector.extract_strided_slice %39 {offsets = [0, 112], sizes = [8, 16], strides = [1, 1]} : vector<8x192xf32> to vector<8x16xf32>
    %113 = vector.extract_strided_slice %39 {offsets = [0, 176], sizes = [8, 16], strides = [1, 1]} : vector<8x192xf32> to vector<8x16xf32>
    %cst_43 = arith.constant dense<0.000000e+00> : vector<8x8xf32>
    %114 = tpu.matmul %111, %112, %cst_43 {dimension_numbers = #tpu.dot_dimension_numbers<[1], [1], [0], [0], [0, 0, 1, 0], [], []>} : vector<8x16xf32>, vector<8x16xf32>, vector<8x8xf32> -> vector<8x8xf32>
    %115 = arith.addf %114, %31 : vector<8x8xf32>
    %cst_44 = arith.constant dense<0xFF800000> : vector<8xf32>
    %116 = vector.multi_reduction <maximumf>, %115, %cst_44 [1] : vector<8x8xf32> to vector<8xf32>
    %117 = vector.shape_cast %116 : vector<8xf32> to vector<8x1xf32>
    %118 = vector.broadcast %117 : vector<8x1xf32> to vector<8x8xf32>
    %119 = arith.subf %115, %118 : vector<8x8xf32>
    %120 = math.exp %119 : vector<8x8xf32>
    %cst_45 = arith.constant dense<0.000000e+00> : vector<8xf32>
    %121 = vector.multi_reduction <add>, %120, %cst_45 [1] : vector<8x8xf32> to vector<8xf32>
    %122 = vector.shape_cast %121 : vector<8xf32> to vector<8x1xf32>
    %123 = tpu.reciprocal %122 {approx = true} : vector<8x1xf32> -> vector<8x1xf32>
    %124 = vector.broadcast %123 : vector<8x1xf32> to vector<8x8xf32>
    %125 = arith.mulf %120, %124 : vector<8x8xf32>
    %cst_46 = arith.constant dense<0.000000e+00> : vector<8x16xf32>
    %126 = tpu.matmul %125, %113, %cst_46 {dimension_numbers = #tpu.dot_dimension_numbers<[1], [0], [0], [1], [0, 0, 1, 1], [], []>} : vector<8x8xf32>, vector<8x16xf32>, vector<8x16xf32> -> vector<8x16xf32>
    %127 = vector.extract_strided_slice %41 {offsets = [48, 0], sizes = [16, 64], strides = [1, 1]} : vector<64x64xbf16> to vector<16x64xbf16>
    %128 = arith.truncf %126 : vector<8x16xf32> to vector<8x16xbf16>
    %cst_47 = arith.constant dense<0.000000e+00> : vector<8x64xf32>
    %129 = tpu.matmul %128, %127, %cst_47 {dimension_numbers = #tpu.dot_dimension_numbers<[1], [0], [0], [1], [0, 0, 1, 1], [], []>} : vector<8x16xbf16>, vector<16x64xbf16>, vector<8x64xf32> -> vector<8x64xf32>
    %130 = arith.addf %108, %129 : vector<8x64xf32>
    %c0_48 = arith.constant 0 : index
    %c0_49 = arith.constant 0 : index
    %c0_50 = arith.constant 0 : index
    %131 = vector.load %arg8[%c0_48, %c0_49, %c0_50] : memref<2x1x64xf32, #tpu.memory_space<vmem>>, vector<1x1x64xf32>
    %132 = vector.shape_cast %131 : vector<1x1x64xf32> to vector<1x64xf32>
    %133 = vector.broadcast %132 : vector<1x64xf32> to vector<8x64xf32>
    %134 = arith.addf %130, %133 : vector<8x64xf32>
    %135 = arith.addf %27, %134 : vector<8x64xf32>
    %c0_51 = arith.constant 0 : index
    %c0_52 = arith.constant 0 : index
    %c0_53 = arith.constant 0 : index
    %136 = vector.load %arg9[%c0_51, %c0_52, %c0_53] : memref<2x1x64xf32, #tpu.memory_space<vmem>>, vector<1x1x64xf32>
    %137 = vector.shape_cast %136 : vector<1x1x64xf32> to vector<1x64xf32>
    %c0_54 = arith.constant 0 : index
    %c0_55 = arith.constant 0 : index
    %c0_56 = arith.constant 0 : index
    %138 = vector.load %arg10[%c0_54, %c0_55, %c0_56] : memref<2x1x64xf32, #tpu.memory_space<vmem>>, vector<1x1x64xf32>
    %139 = vector.shape_cast %138 : vector<1x1x64xf32> to vector<1x64xf32>
    %cst_57 = arith.constant dense<0.000000e+00> : vector<8xf32>
    %140 = vector.multi_reduction <add>, %135, %cst_57 [1] : vector<8x64xf32> to vector<8xf32>
    %141 = vector.shape_cast %140 : vector<8xf32> to vector<8x1xf32>
    %cst_58 = arith.constant 6.400000e+01 : f32
    %142 = vector.broadcast %cst_58 : f32 to vector<8x1xf32>
    %143 = arith.divf %141, %142 : vector<8x1xf32>
    %144 = vector.broadcast %143 : vector<8x1xf32> to vector<8x64xf32>
    %145 = arith.subf %135, %144 : vector<8x64xf32>
    %146 = vector.broadcast %143 : vector<8x1xf32> to vector<8x64xf32>
    %147 = arith.subf %135, %146 : vector<8x64xf32>
    %148 = arith.mulf %145, %147 : vector<8x64xf32>
    %cst_59 = arith.constant dense<0.000000e+00> : vector<8xf32>
    %149 = vector.multi_reduction <add>, %148, %cst_59 [1] : vector<8x64xf32> to vector<8xf32>
    %150 = vector.shape_cast %149 : vector<8xf32> to vector<8x1xf32>
    %cst_60 = arith.constant 6.400000e+01 : f32
    %151 = vector.broadcast %cst_60 : f32 to vector<8x1xf32>
    %152 = arith.divf %150, %151 : vector<8x1xf32>
    %153 = vector.broadcast %143 : vector<8x1xf32> to vector<8x64xf32>
    %154 = arith.subf %135, %153 : vector<8x64xf32>
    %cst_61 = arith.constant 9.99999974E-6 : f32
    %155 = vector.broadcast %cst_61 : f32 to vector<8x1xf32>
    %156 = arith.addf %152, %155 : vector<8x1xf32>
    %157 = math.rsqrt %156 : vector<8x1xf32>
    %158 = vector.broadcast %157 : vector<8x1xf32> to vector<8x64xf32>
    %159 = arith.mulf %154, %158 : vector<8x64xf32>
    %160 = vector.broadcast %137 : vector<1x64xf32> to vector<8x64xf32>
    %161 = arith.mulf %159, %160 : vector<8x64xf32>
    %162 = vector.broadcast %139 : vector<1x64xf32> to vector<8x64xf32>
    %163 = arith.addf %161, %162 : vector<8x64xf32>
    %c0_62 = arith.constant 0 : index
    %c0_63 = arith.constant 0 : index
    %c0_64 = arith.constant 0 : index
    %164 = vector.load %arg11[%c0_62, %c0_63, %c0_64] : memref<2x64x128xbf16, #tpu.memory_space<vmem>>, vector<1x64x128xbf16>
    %165 = vector.shape_cast %164 : vector<1x64x128xbf16> to vector<64x128xbf16>
    %166 = arith.truncf %163 : vector<8x64xf32> to vector<8x64xbf16>
    %cst_65 = arith.constant dense<0.000000e+00> : vector<8x128xf32>
    %167 = tpu.matmul %166, %165, %cst_65 {dimension_numbers = #tpu.dot_dimension_numbers<[1], [0], [0], [1], [0, 0, 1, 1], [], []>} : vector<8x64xbf16>, vector<64x128xbf16>, vector<8x128xf32> -> vector<8x128xf32>
    %c0_66 = arith.constant 0 : index
    %c0_67 = arith.constant 0 : index
    %c0_68 = arith.constant 0 : index
    %168 = vector.load %arg12[%c0_66, %c0_67, %c0_68] : memref<2x1x128xf32, #tpu.memory_space<vmem>>, vector<1x1x128xf32>
    %169 = vector.shape_cast %168 : vector<1x1x128xf32> to vector<1x128xf32>
    %170 = vector.broadcast %169 : vector<1x128xf32> to vector<8x128xf32>
    %171 = arith.addf %167, %170 : vector<8x128xf32>
    %cst_69 = arith.constant 5.000000e-01 : f32
    %172 = vector.broadcast %cst_69 : f32 to vector<8x128xf32>
    %173 = arith.mulf %172, %171 : vector<8x128xf32>
    %cst_70 = arith.constant 4.471500e-02 : f32
    %174 = vector.broadcast %cst_70 : f32 to vector<8x128xf32>
    %175 = arith.mulf %174, %171 : vector<8x128xf32>
    %176 = arith.mulf %175, %171 : vector<8x128xf32>
    %177 = arith.mulf %176, %171 : vector<8x128xf32>
    %178 = arith.addf %171, %177 : vector<8x128xf32>
    %cst_71 = arith.constant 0.797884583 : f32
    %179 = vector.broadcast %cst_71 : f32 to vector<8x128xf32>
    %180 = arith.mulf %179, %178 : vector<8x128xf32>
    %181 = math.tanh %180 : vector<8x128xf32>
    %cst_72 = arith.constant 1.000000e+00 : f32
    %182 = vector.broadcast %cst_72 : f32 to vector<8x128xf32>
    %183 = arith.addf %182, %181 : vector<8x128xf32>
    %184 = arith.mulf %173, %183 : vector<8x128xf32>
    %c0_73 = arith.constant 0 : index
    %c0_74 = arith.constant 0 : index
    %c0_75 = arith.constant 0 : index
    %185 = vector.load %arg13[%c0_73, %c0_74, %c0_75] : memref<2x128x64xbf16, #tpu.memory_space<vmem>>, vector<1x128x64xbf16>
    %186 = vector.shape_cast %185 : vector<1x128x64xbf16> to vector<128x64xbf16>
    %187 = arith.truncf %184 : vector<8x128xf32> to vector<8x128xbf16>
    %cst_76 = arith.constant dense<0.000000e+00> : vector<8x64xf32>
    %188 = tpu.matmul %187, %186, %cst_76 {dimension_numbers = #tpu.dot_dimension_numbers<[1], [0], [0], [1], [0, 0, 1, 1], [], []>} : vector<8x128xbf16>, vector<128x64xbf16>, vector<8x64xf32> -> vector<8x64xf32>
    %c0_77 = arith.constant 0 : index
    %c0_78 = arith.constant 0 : index
    %c0_79 = arith.constant 0 : index
    %189 = vector.load %arg14[%c0_77, %c0_78, %c0_79] : memref<2x1x64xf32, #tpu.memory_space<vmem>>, vector<1x1x64xf32>
    %190 = vector.shape_cast %189 : vector<1x1x64xf32> to vector<1x64xf32>
    %191 = vector.broadcast %190 : vector<1x64xf32> to vector<8x64xf32>
    %192 = arith.addf %188, %191 : vector<8x64xf32>
    %193 = arith.addf %163, %192 : vector<8x64xf32>
    %c0_80 = arith.constant 0 : index
    %c0_81 = arith.constant 0 : index
    %c0_82 = arith.constant 0 : index
    %194 = vector.load %arg15[%c0_80, %c0_81, %c0_82] : memref<2x1x64xf32, #tpu.memory_space<vmem>>, vector<1x1x64xf32>
    %195 = vector.shape_cast %194 : vector<1x1x64xf32> to vector<1x64xf32>
    %c0_83 = arith.constant 0 : index
    %c0_84 = arith.constant 0 : index
    %c0_85 = arith.constant 0 : index
    %196 = vector.load %arg16[%c0_83, %c0_84, %c0_85] : memref<2x1x64xf32, #tpu.memory_space<vmem>>, vector<1x1x64xf32>
    %197 = vector.shape_cast %196 : vector<1x1x64xf32> to vector<1x64xf32>
    %cst_86 = arith.constant dense<0.000000e+00> : vector<8xf32>
    %198 = vector.multi_reduction <add>, %193, %cst_86 [1] : vector<8x64xf32> to vector<8xf32>
    %199 = vector.shape_cast %198 : vector<8xf32> to vector<8x1xf32>
    %cst_87 = arith.constant 6.400000e+01 : f32
    %200 = vector.broadcast %cst_87 : f32 to vector<8x1xf32>
    %201 = arith.divf %199, %200 : vector<8x1xf32>
    %202 = vector.broadcast %201 : vector<8x1xf32> to vector<8x64xf32>
    %203 = arith.subf %193, %202 : vector<8x64xf32>
    %204 = vector.broadcast %201 : vector<8x1xf32> to vector<8x64xf32>
    %205 = arith.subf %193, %204 : vector<8x64xf32>
    %206 = arith.mulf %203, %205 : vector<8x64xf32>
    %cst_88 = arith.constant dense<0.000000e+00> : vector<8xf32>
    %207 = vector.multi_reduction <add>, %206, %cst_88 [1] : vector<8x64xf32> to vector<8xf32>
    %208 = vector.shape_cast %207 : vector<8xf32> to vector<8x1xf32>
    %cst_89 = arith.constant 6.400000e+01 : f32
    %209 = vector.broadcast %cst_89 : f32 to vector<8x1xf32>
    %210 = arith.divf %208, %209 : vector<8x1xf32>
    %211 = vector.broadcast %201 : vector<8x1xf32> to vector<8x64xf32>
    %212 = arith.subf %193, %211 : vector<8x64xf32>
    %cst_90 = arith.constant 9.99999974E-6 : f32
    %213 = vector.broadcast %cst_90 : f32 to vector<8x1xf32>
    %214 = arith.addf %210, %213 : vector<8x1xf32>
    %215 = math.rsqrt %214 : vector<8x1xf32>
    %216 = vector.broadcast %215 : vector<8x1xf32> to vector<8x64xf32>
    %217 = arith.mulf %212, %216 : vector<8x64xf32>
    %218 = vector.broadcast %195 : vector<1x64xf32> to vector<8x64xf32>
    %219 = arith.mulf %217, %218 : vector<8x64xf32>
    %220 = vector.broadcast %197 : vector<1x64xf32> to vector<8x64xf32>
    %221 = arith.addf %219, %220 : vector<8x64xf32>
    %c1 = arith.constant 1 : index
    %c0_91 = arith.constant 0 : index
    %c0_92 = arith.constant 0 : index
    %222 = vector.load %arg5[%c1, %c0_91, %c0_92] : memref<2x64x192xbf16, #tpu.memory_space<vmem>>, vector<1x64x192xbf16>
    %223 = vector.shape_cast %222 : vector<1x64x192xbf16> to vector<64x192xbf16>
    %224 = arith.truncf %221 : vector<8x64xf32> to vector<8x64xbf16>
    %cst_93 = arith.constant dense<0.000000e+00> : vector<8x192xf32>
    %225 = tpu.matmul %224, %223, %cst_93 {dimension_numbers = #tpu.dot_dimension_numbers<[1], [0], [0], [1], [0, 0, 1, 1], [], []>} : vector<8x64xbf16>, vector<64x192xbf16>, vector<8x192xf32> -> vector<8x192xf32>
    %c1_94 = arith.constant 1 : index
    %c0_95 = arith.constant 0 : index
    %c0_96 = arith.constant 0 : index
    %226 = vector.load %arg6[%c1_94, %c0_95, %c0_96] : memref<2x1x192xf32, #tpu.memory_space<vmem>>, vector<1x1x192xf32>
    %227 = vector.shape_cast %226 : vector<1x1x192xf32> to vector<1x192xf32>
    %228 = vector.broadcast %227 : vector<1x192xf32> to vector<8x192xf32>
    %229 = arith.addf %225, %228 : vector<8x192xf32>
    %c1_97 = arith.constant 1 : index
    %c0_98 = arith.constant 0 : index
    %c0_99 = arith.constant 0 : index
    %230 = vector.load %arg7[%c1_97, %c0_98, %c0_99] : memref<2x64x64xbf16, #tpu.memory_space<vmem>>, vector<1x64x64xbf16>
    %231 = vector.shape_cast %230 : vector<1x64x64xbf16> to vector<64x64xbf16>
    %cst_100 = arith.constant 0.000000e+00 : f32
    %232 = vector.broadcast %cst_100 : f32 to vector<8x64xf32>
    %233 = vector.extract_strided_slice %229 {offsets = [0, 0], sizes = [8, 16], strides = [1, 1]} : vector<8x192xf32> to vector<8x16xf32>
    %cst_101 = arith.constant 2.500000e-01 : f32
    %234 = vector.broadcast %cst_101 : f32 to vector<8x16xf32>
    %235 = arith.mulf %233, %234 : vector<8x16xf32>
    %236 = vector.extract_strided_slice %229 {offsets = [0, 64], sizes = [8, 16], strides = [1, 1]} : vector<8x192xf32> to vector<8x16xf32>
    %237 = vector.extract_strided_slice %229 {offsets = [0, 128], sizes = [8, 16], strides = [1, 1]} : vector<8x192xf32> to vector<8x16xf32>
    %cst_102 = arith.constant dense<0.000000e+00> : vector<8x8xf32>
    %238 = tpu.matmul %235, %236, %cst_102 {dimension_numbers = #tpu.dot_dimension_numbers<[1], [1], [0], [0], [0, 0, 1, 0], [], []>} : vector<8x16xf32>, vector<8x16xf32>, vector<8x8xf32> -> vector<8x8xf32>
    %239 = arith.addf %238, %31 : vector<8x8xf32>
    %cst_103 = arith.constant dense<0xFF800000> : vector<8xf32>
    %240 = vector.multi_reduction <maximumf>, %239, %cst_103 [1] : vector<8x8xf32> to vector<8xf32>
    %241 = vector.shape_cast %240 : vector<8xf32> to vector<8x1xf32>
    %242 = vector.broadcast %241 : vector<8x1xf32> to vector<8x8xf32>
    %243 = arith.subf %239, %242 : vector<8x8xf32>
    %244 = math.exp %243 : vector<8x8xf32>
    %cst_104 = arith.constant dense<0.000000e+00> : vector<8xf32>
    %245 = vector.multi_reduction <add>, %244, %cst_104 [1] : vector<8x8xf32> to vector<8xf32>
    %246 = vector.shape_cast %245 : vector<8xf32> to vector<8x1xf32>
    %247 = tpu.reciprocal %246 {approx = true} : vector<8x1xf32> -> vector<8x1xf32>
    %248 = vector.broadcast %247 : vector<8x1xf32> to vector<8x8xf32>
    %249 = arith.mulf %244, %248 : vector<8x8xf32>
    %cst_105 = arith.constant dense<0.000000e+00> : vector<8x16xf32>
    %250 = tpu.matmul %249, %237, %cst_105 {dimension_numbers = #tpu.dot_dimension_numbers<[1], [0], [0], [1], [0, 0, 1, 1], [], []>} : vector<8x8xf32>, vector<8x16xf32>, vector<8x16xf32> -> vector<8x16xf32>
    %251 = vector.extract_strided_slice %231 {offsets = [0, 0], sizes = [16, 64], strides = [1, 1]} : vector<64x64xbf16> to vector<16x64xbf16>
    %252 = arith.truncf %250 : vector<8x16xf32> to vector<8x16xbf16>
    %cst_106 = arith.constant dense<0.000000e+00> : vector<8x64xf32>
    %253 = tpu.matmul %252, %251, %cst_106 {dimension_numbers = #tpu.dot_dimension_numbers<[1], [0], [0], [1], [0, 0, 1, 1], [], []>} : vector<8x16xbf16>, vector<16x64xbf16>, vector<8x64xf32> -> vector<8x64xf32>
    %254 = arith.addf %232, %253 : vector<8x64xf32>
    %255 = vector.extract_strided_slice %229 {offsets = [0, 16], sizes = [8, 16], strides = [1, 1]} : vector<8x192xf32> to vector<8x16xf32>
    %cst_107 = arith.constant 2.500000e-01 : f32
    %256 = vector.broadcast %cst_107 : f32 to vector<8x16xf32>
    %257 = arith.mulf %255, %256 : vector<8x16xf32>
    %258 = vector.extract_strided_slice %229 {offsets = [0, 80], sizes = [8, 16], strides = [1, 1]} : vector<8x192xf32> to vector<8x16xf32>
    %259 = vector.extract_strided_slice %229 {offsets = [0, 144], sizes = [8, 16], strides = [1, 1]} : vector<8x192xf32> to vector<8x16xf32>
    %cst_108 = arith.constant dense<0.000000e+00> : vector<8x8xf32>
    %260 = tpu.matmul %257, %258, %cst_108 {dimension_numbers = #tpu.dot_dimension_numbers<[1], [1], [0], [0], [0, 0, 1, 0], [], []>} : vector<8x16xf32>, vector<8x16xf32>, vector<8x8xf32> -> vector<8x8xf32>
    %261 = arith.addf %260, %31 : vector<8x8xf32>
    %cst_109 = arith.constant dense<0xFF800000> : vector<8xf32>
    %262 = vector.multi_reduction <maximumf>, %261, %cst_109 [1] : vector<8x8xf32> to vector<8xf32>
    %263 = vector.shape_cast %262 : vector<8xf32> to vector<8x1xf32>
    %264 = vector.broadcast %263 : vector<8x1xf32> to vector<8x8xf32>
    %265 = arith.subf %261, %264 : vector<8x8xf32>
    %266 = math.exp %265 : vector<8x8xf32>
    %cst_110 = arith.constant dense<0.000000e+00> : vector<8xf32>
    %267 = vector.multi_reduction <add>, %266, %cst_110 [1] : vector<8x8xf32> to vector<8xf32>
    %268 = vector.shape_cast %267 : vector<8xf32> to vector<8x1xf32>
    %269 = tpu.reciprocal %268 {approx = true} : vector<8x1xf32> -> vector<8x1xf32>
    %270 = vector.broadcast %269 : vector<8x1xf32> to vector<8x8xf32>
    %271 = arith.mulf %266, %270 : vector<8x8xf32>
    %cst_111 = arith.constant dense<0.000000e+00> : vector<8x16xf32>
    %272 = tpu.matmul %271, %259, %cst_111 {dimension_numbers = #tpu.dot_dimension_numbers<[1], [0], [0], [1], [0, 0, 1, 1], [], []>} : vector<8x8xf32>, vector<8x16xf32>, vector<8x16xf32> -> vector<8x16xf32>
    %273 = vector.extract_strided_slice %231 {offsets = [16, 0], sizes = [16, 64], strides = [1, 1]} : vector<64x64xbf16> to vector<16x64xbf16>
    %274 = arith.truncf %272 : vector<8x16xf32> to vector<8x16xbf16>
    %cst_112 = arith.constant dense<0.000000e+00> : vector<8x64xf32>
    %275 = tpu.matmul %274, %273, %cst_112 {dimension_numbers = #tpu.dot_dimension_numbers<[1], [0], [0], [1], [0, 0, 1, 1], [], []>} : vector<8x16xbf16>, vector<16x64xbf16>, vector<8x64xf32> -> vector<8x64xf32>
    %276 = arith.addf %254, %275 : vector<8x64xf32>
    %277 = vector.extract_strided_slice %229 {offsets = [0, 32], sizes = [8, 16], strides = [1, 1]} : vector<8x192xf32> to vector<8x16xf32>
    %cst_113 = arith.constant 2.500000e-01 : f32
    %278 = vector.broadcast %cst_113 : f32 to vector<8x16xf32>
    %279 = arith.mulf %277, %278 : vector<8x16xf32>
    %280 = vector.extract_strided_slice %229 {offsets = [0, 96], sizes = [8, 16], strides = [1, 1]} : vector<8x192xf32> to vector<8x16xf32>
    %281 = vector.extract_strided_slice %229 {offsets = [0, 160], sizes = [8, 16], strides = [1, 1]} : vector<8x192xf32> to vector<8x16xf32>
    %cst_114 = arith.constant dense<0.000000e+00> : vector<8x8xf32>
    %282 = tpu.matmul %279, %280, %cst_114 {dimension_numbers = #tpu.dot_dimension_numbers<[1], [1], [0], [0], [0, 0, 1, 0], [], []>} : vector<8x16xf32>, vector<8x16xf32>, vector<8x8xf32> -> vector<8x8xf32>
    %283 = arith.addf %282, %31 : vector<8x8xf32>
    %cst_115 = arith.constant dense<0xFF800000> : vector<8xf32>
    %284 = vector.multi_reduction <maximumf>, %283, %cst_115 [1] : vector<8x8xf32> to vector<8xf32>
    %285 = vector.shape_cast %284 : vector<8xf32> to vector<8x1xf32>
    %286 = vector.broadcast %285 : vector<8x1xf32> to vector<8x8xf32>
    %287 = arith.subf %283, %286 : vector<8x8xf32>
    %288 = math.exp %287 : vector<8x8xf32>
    %cst_116 = arith.constant dense<0.000000e+00> : vector<8xf32>
    %289 = vector.multi_reduction <add>, %288, %cst_116 [1] : vector<8x8xf32> to vector<8xf32>
    %290 = vector.shape_cast %289 : vector<8xf32> to vector<8x1xf32>
    %291 = tpu.reciprocal %290 {approx = true} : vector<8x1xf32> -> vector<8x1xf32>
    %292 = vector.broadcast %291 : vector<8x1xf32> to vector<8x8xf32>
    %293 = arith.mulf %288, %292 : vector<8x8xf32>
    %cst_117 = arith.constant dense<0.000000e+00> : vector<8x16xf32>
    %294 = tpu.matmul %293, %281, %cst_117 {dimension_numbers = #tpu.dot_dimension_numbers<[1], [0], [0], [1], [0, 0, 1, 1], [], []>} : vector<8x8xf32>, vector<8x16xf32>, vector<8x16xf32> -> vector<8x16xf32>
    %295 = vector.extract_strided_slice %231 {offsets = [32, 0], sizes = [16, 64], strides = [1, 1]} : vector<64x64xbf16> to vector<16x64xbf16>
    %296 = arith.truncf %294 : vector<8x16xf32> to vector<8x16xbf16>
    %cst_118 = arith.constant dense<0.000000e+00> : vector<8x64xf32>
    %297 = tpu.matmul %296, %295, %cst_118 {dimension_numbers = #tpu.dot_dimension_numbers<[1], [0], [0], [1], [0, 0, 1, 1], [], []>} : vector<8x16xbf16>, vector<16x64xbf16>, vector<8x64xf32> -> vector<8x64xf32>
    %298 = arith.addf %276, %297 : vector<8x64xf32>
    %299 = vector.extract_strided_slice %229 {offsets = [0, 48], sizes = [8, 16], strides = [1, 1]} : vector<8x192xf32> to vector<8x16xf32>
    %cst_119 = arith.constant 2.500000e-01 : f32
    %300 = vector.broadcast %cst_119 : f32 to vector<8x16xf32>
    %301 = arith.mulf %299, %300 : vector<8x16xf32>
    %302 = vector.extract_strided_slice %229 {offsets = [0, 112], sizes = [8, 16], strides = [1, 1]} : vector<8x192xf32> to vector<8x16xf32>
    %303 = vector.extract_strided_slice %229 {offsets = [0, 176], sizes = [8, 16], strides = [1, 1]} : vector<8x192xf32> to vector<8x16xf32>
    %cst_120 = arith.constant dense<0.000000e+00> : vector<8x8xf32>
    %304 = tpu.matmul %301, %302, %cst_120 {dimension_numbers = #tpu.dot_dimension_numbers<[1], [1], [0], [0], [0, 0, 1, 0], [], []>} : vector<8x16xf32>, vector<8x16xf32>, vector<8x8xf32> -> vector<8x8xf32>
    %305 = arith.addf %304, %31 : vector<8x8xf32>
    %cst_121 = arith.constant dense<0xFF800000> : vector<8xf32>
    %306 = vector.multi_reduction <maximumf>, %305, %cst_121 [1] : vector<8x8xf32> to vector<8xf32>
    %307 = vector.shape_cast %306 : vector<8xf32> to vector<8x1xf32>
    %308 = vector.broadcast %307 : vector<8x1xf32> to vector<8x8xf32>
    %309 = arith.subf %305, %308 : vector<8x8xf32>
    %310 = math.exp %309 : vector<8x8xf32>
    %cst_122 = arith.constant dense<0.000000e+00> : vector<8xf32>
    %311 = vector.multi_reduction <add>, %310, %cst_122 [1] : vector<8x8xf32> to vector<8xf32>
    %312 = vector.shape_cast %311 : vector<8xf32> to vector<8x1xf32>
    %313 = tpu.reciprocal %312 {approx = true} : vector<8x1xf32> -> vector<8x1xf32>
    %314 = vector.broadcast %313 : vector<8x1xf32> to vector<8x8xf32>
    %315 = arith.mulf %310, %314 : vector<8x8xf32>
    %cst_123 = arith.constant dense<0.000000e+00> : vector<8x16xf32>
    %316 = tpu.matmul %315, %303, %cst_123 {dimension_numbers = #tpu.dot_dimension_numbers<[1], [0], [0], [1], [0, 0, 1, 1], [], []>} : vector<8x8xf32>, vector<8x16xf32>, vector<8x16xf32> -> vector<8x16xf32>
    %317 = vector.extract_strided_slice %231 {offsets = [48, 0], sizes = [16, 64], strides = [1, 1]} : vector<64x64xbf16> to vector<16x64xbf16>
    %318 = arith.truncf %316 : vector<8x16xf32> to vector<8x16xbf16>
    %cst_124 = arith.constant dense<0.000000e+00> : vector<8x64xf32>
    %319 = tpu.matmul %318, %317, %cst_124 {dimension_numbers = #tpu.dot_dimension_numbers<[1], [0], [0], [1], [0, 0, 1, 1], [], []>} : vector<8x16xbf16>, vector<16x64xbf16>, vector<8x64xf32> -> vector<8x64xf32>
    %320 = arith.addf %298, %319 : vector<8x64xf32>
    %c1_125 = arith.constant 1 : index
    %c0_126 = arith.constant 0 : index
    %c0_127 = arith.constant 0 : index
    %321 = vector.load %arg8[%c1_125, %c0_126, %c0_127] : memref<2x1x64xf32, #tpu.memory_space<vmem>>, vector<1x1x64xf32>
    %322 = vector.shape_cast %321 : vector<1x1x64xf32> to vector<1x64xf32>
    %323 = vector.broadcast %322 : vector<1x64xf32> to vector<8x64xf32>
    %324 = arith.addf %320, %323 : vector<8x64xf32>
    %325 = arith.addf %221, %324 : vector<8x64xf32>
    %c1_128 = arith.constant 1 : index
    %c0_129 = arith.constant 0 : index
    %c0_130 = arith.constant 0 : index
    %326 = vector.load %arg9[%c1_128, %c0_129, %c0_130] : memref<2x1x64xf32, #tpu.memory_space<vmem>>, vector<1x1x64xf32>
    %327 = vector.shape_cast %326 : vector<1x1x64xf32> to vector<1x64xf32>
    %c1_131 = arith.constant 1 : index
    %c0_132 = arith.constant 0 : index
    %c0_133 = arith.constant 0 : index
    %328 = vector.load %arg10[%c1_131, %c0_132, %c0_133] : memref<2x1x64xf32, #tpu.memory_space<vmem>>, vector<1x1x64xf32>
    %329 = vector.shape_cast %328 : vector<1x1x64xf32> to vector<1x64xf32>
    %cst_134 = arith.constant dense<0.000000e+00> : vector<8xf32>
    %330 = vector.multi_reduction <add>, %325, %cst_134 [1] : vector<8x64xf32> to vector<8xf32>
    %331 = vector.shape_cast %330 : vector<8xf32> to vector<8x1xf32>
    %cst_135 = arith.constant 6.400000e+01 : f32
    %332 = vector.broadcast %cst_135 : f32 to vector<8x1xf32>
    %333 = arith.divf %331, %332 : vector<8x1xf32>
    %334 = vector.broadcast %333 : vector<8x1xf32> to vector<8x64xf32>
    %335 = arith.subf %325, %334 : vector<8x64xf32>
    %336 = vector.broadcast %333 : vector<8x1xf32> to vector<8x64xf32>
    %337 = arith.subf %325, %336 : vector<8x64xf32>
    %338 = arith.mulf %335, %337 : vector<8x64xf32>
    %cst_136 = arith.constant dense<0.000000e+00> : vector<8xf32>
    %339 = vector.multi_reduction <add>, %338, %cst_136 [1] : vector<8x64xf32> to vector<8xf32>
    %340 = vector.shape_cast %339 : vector<8xf32> to vector<8x1xf32>
    %cst_137 = arith.constant 6.400000e+01 : f32
    %341 = vector.broadcast %cst_137 : f32 to vector<8x1xf32>
    %342 = arith.divf %340, %341 : vector<8x1xf32>
    %343 = vector.broadcast %333 : vector<8x1xf32> to vector<8x64xf32>
    %344 = arith.subf %325, %343 : vector<8x64xf32>
    %cst_138 = arith.constant 9.99999974E-6 : f32
    %345 = vector.broadcast %cst_138 : f32 to vector<8x1xf32>
    %346 = arith.addf %342, %345 : vector<8x1xf32>
    %347 = math.rsqrt %346 : vector<8x1xf32>
    %348 = vector.broadcast %347 : vector<8x1xf32> to vector<8x64xf32>
    %349 = arith.mulf %344, %348 : vector<8x64xf32>
    %350 = vector.broadcast %327 : vector<1x64xf32> to vector<8x64xf32>
    %351 = arith.mulf %349, %350 : vector<8x64xf32>
    %352 = vector.broadcast %329 : vector<1x64xf32> to vector<8x64xf32>
    %353 = arith.addf %351, %352 : vector<8x64xf32>
    %c1_139 = arith.constant 1 : index
    %c0_140 = arith.constant 0 : index
    %c0_141 = arith.constant 0 : index
    %354 = vector.load %arg11[%c1_139, %c0_140, %c0_141] : memref<2x64x128xbf16, #tpu.memory_space<vmem>>, vector<1x64x128xbf16>
    %355 = vector.shape_cast %354 : vector<1x64x128xbf16> to vector<64x128xbf16>
    %356 = arith.truncf %353 : vector<8x64xf32> to vector<8x64xbf16>
    %cst_142 = arith.constant dense<0.000000e+00> : vector<8x128xf32>
    %357 = tpu.matmul %356, %355, %cst_142 {dimension_numbers = #tpu.dot_dimension_numbers<[1], [0], [0], [1], [0, 0, 1, 1], [], []>} : vector<8x64xbf16>, vector<64x128xbf16>, vector<8x128xf32> -> vector<8x128xf32>
    %c1_143 = arith.constant 1 : index
    %c0_144 = arith.constant 0 : index
    %c0_145 = arith.constant 0 : index
    %358 = vector.load %arg12[%c1_143, %c0_144, %c0_145] : memref<2x1x128xf32, #tpu.memory_space<vmem>>, vector<1x1x128xf32>
    %359 = vector.shape_cast %358 : vector<1x1x128xf32> to vector<1x128xf32>
    %360 = vector.broadcast %359 : vector<1x128xf32> to vector<8x128xf32>
    %361 = arith.addf %357, %360 : vector<8x128xf32>
    %cst_146 = arith.constant 5.000000e-01 : f32
    %362 = vector.broadcast %cst_146 : f32 to vector<8x128xf32>
    %363 = arith.mulf %362, %361 : vector<8x128xf32>
    %cst_147 = arith.constant 4.471500e-02 : f32
    %364 = vector.broadcast %cst_147 : f32 to vector<8x128xf32>
    %365 = arith.mulf %364, %361 : vector<8x128xf32>
    %366 = arith.mulf %365, %361 : vector<8x128xf32>
    %367 = arith.mulf %366, %361 : vector<8x128xf32>
    %368 = arith.addf %361, %367 : vector<8x128xf32>
    %cst_148 = arith.constant 0.797884583 : f32
    %369 = vector.broadcast %cst_148 : f32 to vector<8x128xf32>
    %370 = arith.mulf %369, %368 : vector<8x128xf32>
    %371 = math.tanh %370 : vector<8x128xf32>
    %cst_149 = arith.constant 1.000000e+00 : f32
    %372 = vector.broadcast %cst_149 : f32 to vector<8x128xf32>
    %373 = arith.addf %372, %371 : vector<8x128xf32>
    %374 = arith.mulf %363, %373 : vector<8x128xf32>
    %c1_150 = arith.constant 1 : index
    %c0_151 = arith.constant 0 : index
    %c0_152 = arith.constant 0 : index
    %375 = vector.load %arg13[%c1_150, %c0_151, %c0_152] : memref<2x128x64xbf16, #tpu.memory_space<vmem>>, vector<1x128x64xbf16>
    %376 = vector.shape_cast %375 : vector<1x128x64xbf16> to vector<128x64xbf16>
    %377 = arith.truncf %374 : vector<8x128xf32> to vector<8x128xbf16>
    %cst_153 = arith.constant dense<0.000000e+00> : vector<8x64xf32>
    %378 = tpu.matmul %377, %376, %cst_153 {dimension_numbers = #tpu.dot_dimension_numbers<[1], [0], [0], [1], [0, 0, 1, 1], [], []>} : vector<8x128xbf16>, vector<128x64xbf16>, vector<8x64xf32> -> vector<8x64xf32>
    %c1_154 = arith.constant 1 : index
    %c0_155 = arith.constant 0 : index
    %c0_156 = arith.constant 0 : index
    %379 = vector.load %arg14[%c1_154, %c0_155, %c0_156] : memref<2x1x64xf32, #tpu.memory_space<vmem>>, vector<1x1x64xf32>
    %380 = vector.shape_cast %379 : vector<1x1x64xf32> to vector<1x64xf32>
    %381 = vector.broadcast %380 : vector<1x64xf32> to vector<8x64xf32>
    %382 = arith.addf %378, %381 : vector<8x64xf32>
    %383 = arith.addf %353, %382 : vector<8x64xf32>
    %c1_157 = arith.constant 1 : index
    %c0_158 = arith.constant 0 : index
    %c0_159 = arith.constant 0 : index
    %384 = vector.load %arg15[%c1_157, %c0_158, %c0_159] : memref<2x1x64xf32, #tpu.memory_space<vmem>>, vector<1x1x64xf32>
    %385 = vector.shape_cast %384 : vector<1x1x64xf32> to vector<1x64xf32>
    %c1_160 = arith.constant 1 : index
    %c0_161 = arith.constant 0 : index
    %c0_162 = arith.constant 0 : index
    %386 = vector.load %arg16[%c1_160, %c0_161, %c0_162] : memref<2x1x64xf32, #tpu.memory_space<vmem>>, vector<1x1x64xf32>
    %387 = vector.shape_cast %386 : vector<1x1x64xf32> to vector<1x64xf32>
    %cst_163 = arith.constant dense<0.000000e+00> : vector<8xf32>
    %388 = vector.multi_reduction <add>, %383, %cst_163 [1] : vector<8x64xf32> to vector<8xf32>
    %389 = vector.shape_cast %388 : vector<8xf32> to vector<8x1xf32>
    %cst_164 = arith.constant 6.400000e+01 : f32
    %390 = vector.broadcast %cst_164 : f32 to vector<8x1xf32>
    %391 = arith.divf %389, %390 : vector<8x1xf32>
    %392 = vector.broadcast %391 : vector<8x1xf32> to vector<8x64xf32>
    %393 = arith.subf %383, %392 : vector<8x64xf32>
    %394 = vector.broadcast %391 : vector<8x1xf32> to vector<8x64xf32>
    %395 = arith.subf %383, %394 : vector<8x64xf32>
    %396 = arith.mulf %393, %395 : vector<8x64xf32>
    %cst_165 = arith.constant dense<0.000000e+00> : vector<8xf32>
    %397 = vector.multi_reduction <add>, %396, %cst_165 [1] : vector<8x64xf32> to vector<8xf32>
    %398 = vector.shape_cast %397 : vector<8xf32> to vector<8x1xf32>
    %cst_166 = arith.constant 6.400000e+01 : f32
    %399 = vector.broadcast %cst_166 : f32 to vector<8x1xf32>
    %400 = arith.divf %398, %399 : vector<8x1xf32>
    %401 = vector.broadcast %391 : vector<8x1xf32> to vector<8x64xf32>
    %402 = arith.subf %383, %401 : vector<8x64xf32>
    %cst_167 = arith.constant 9.99999974E-6 : f32
    %403 = vector.broadcast %cst_167 : f32 to vector<8x1xf32>
    %404 = arith.addf %400, %403 : vector<8x1xf32>
    %405 = math.rsqrt %404 : vector<8x1xf32>
    %406 = vector.broadcast %405 : vector<8x1xf32> to vector<8x64xf32>
    %407 = arith.mulf %402, %406 : vector<8x64xf32>
    %408 = vector.broadcast %385 : vector<1x64xf32> to vector<8x64xf32>
    %409 = arith.mulf %407, %408 : vector<8x64xf32>
    %410 = vector.broadcast %387 : vector<1x64xf32> to vector<8x64xf32>
    %411 = arith.addf %409, %410 : vector<8x64xf32>
    %412 = vector.extract_strided_slice %411 {offsets = [0, 0], sizes = [1, 64], strides = [1, 1]} : vector<8x64xf32> to vector<1x64xf32>
    %c0_168 = arith.constant 0 : index
    %c0_169 = arith.constant 0 : index
    %413 = vector.load %arg17[%c0_168, %c0_169] : memref<64x64xbf16, #tpu.memory_space<vmem>>, vector<64x64xbf16>
    %414 = arith.truncf %412 : vector<1x64xf32> to vector<1x64xbf16>
    %cst_170 = arith.constant dense<0.000000e+00> : vector<1x64xf32>
    %415 = tpu.matmul %414, %413, %cst_170 {dimension_numbers = #tpu.dot_dimension_numbers<[1], [0], [0], [1], [0, 0, 1, 1], [], []>} : vector<1x64xbf16>, vector<64x64xbf16>, vector<1x64xf32> -> vector<1x64xf32>
    %c0_171 = arith.constant 0 : index
    %c0_172 = arith.constant 0 : index
    %416 = vector.load %arg18[%c0_171, %c0_172] : memref<1x64xf32, #tpu.memory_space<vmem>>, vector<1x64xf32>
    %417 = arith.addf %415, %416 : vector<1x64xf32>
    %cst_173 = arith.constant 0.000000e+00 : f32
    %418 = vector.broadcast %cst_173 : f32 to vector<1x64xf32>
    %419 = arith.maximumf %417, %418 : vector<1x64xf32>
    %c0_174 = arith.constant 0 : index
    %c0_175 = arith.constant 0 : index
    %420 = vector.load %arg19[%c0_174, %c0_175] : memref<64x128xbf16, #tpu.memory_space<vmem>>, vector<64x128xbf16>
    %421 = arith.truncf %419 : vector<1x64xf32> to vector<1x64xbf16>
    %cst_176 = arith.constant dense<0.000000e+00> : vector<1x128xf32>
    %422 = tpu.matmul %421, %420, %cst_176 {dimension_numbers = #tpu.dot_dimension_numbers<[1], [0], [0], [1], [0, 0, 1, 1], [], []>} : vector<1x64xbf16>, vector<64x128xbf16>, vector<1x128xf32> -> vector<1x128xf32>
    %c0_177 = arith.constant 0 : index
    %c0_178 = arith.constant 0 : index
    %423 = vector.load %arg20[%c0_177, %c0_178] : memref<1x128xf32, #tpu.memory_space<vmem>>, vector<1x128xf32>
    %424 = arith.addf %422, %423 : vector<1x128xf32>
    %c0_179 = arith.constant 0 : index
    %c0_180 = arith.constant 0 : index
    %c0_181 = arith.constant 0 : index
    %425 = vector.load %arg21[%c0_179, %c0_180, %c0_181] : memref<1x1x128xf32, #tpu.memory_space<vmem>>, vector<1x1x128xf32>
    %426 = vector.shape_cast %425 : vector<1x1x128xf32> to vector<1x128xf32>
    %427 = vector.shape_cast %424 : vector<1x128xf32> to vector<1x1x128xf32>
    tpu.vector_store %arg21[%c0_179, %c0_180, %c0_181], %427 {strides = array<i32>} : memref<1x1x128xf32, #tpu.memory_space<vmem>>, vector<1x1x128xf32>,
    return
  }
  func.func @transform_0(%arg0: i32) -> (i32, i32, i32) {
    %c0_i32 = arith.constant 0 : i32
    %c0_i32_0 = arith.constant 0 : i32
    %c0_i32_1 = arith.constant 0 : i32
    return %arg0, %c0_i32, %c0_i32_0 : i32, i32, i32
  }
  func.func @transform_1(%arg0: i32) -> (i32, i32, i32) {
    %c0_i32 = arith.constant 0 : i32
    %c0_i32_0 = arith.constant 0 : i32
    %c0_i32_1 = arith.constant 0 : i32
    return %arg0, %c0_i32, %c0_i32_0 : i32, i32, i32
  }
  func.func @transform_2(%arg0: i32) -> (i32, i32) {
    %c0_i32 = arith.constant 0 : i32
    %c0_i32_0 = arith.constant 0 : i32
    %c0_i32_1 = arith.constant 0 : i32
    return %c0_i32, %c0_i32_0 : i32, i32
  }
  func.func @transform_3(%arg0: i32) -> (i32, i32) {
    %c0_i32 = arith.constant 0 : i32
    %c0_i32_0 = arith.constant 0 : i32
    %c0_i32_1 = arith.constant 0 : i32
    return %c0_i32, %c0_i32_0 : i32, i32
  }
  func.func @transform_4(%arg0: i32) -> (i32, i32, i32) {
    %c0_i32 = arith.constant 0 : i32
    %c0_i32_0 = arith.constant 0 : i32
    %c0_i32_1 = arith.constant 0 : i32
    %c0_i32_2 = arith.constant 0 : i32
    return %c0_i32, %c0_i32_0, %c0_i32_1 : i32, i32, i32
  }
  func.func @transform_5(%arg0: i32) -> (i32, i32, i32) {
    %c0_i32 = arith.constant 0 : i32
    %c0_i32_0 = arith.constant 0 : i32
    %c0_i32_1 = arith.constant 0 : i32
    %c0_i32_2 = arith.constant 0 : i32
    return %c0_i32, %c0_i32_0, %c0_i32_1 : i32, i32, i32
  }
  func.func @transform_6(%arg0: i32) -> (i32, i32, i32) {
    %c0_i32 = arith.constant 0 : i32
    %c0_i32_0 = arith.constant 0 : i32
    %c0_i32_1 = arith.constant 0 : i32
    %c0_i32_2 = arith.constant 0 : i32
    return %c0_i32, %c0_i32_0, %c0_i32_1 : i32, i32, i32
  }
  func.func @transform_7(%arg0: i32) -> (i32, i32, i32) {
    %c0_i32 = arith.constant 0 : i32
    %c0_i32_0 = arith.constant 0 : i32
    %c0_i32_1 = arith.constant 0 : i32
    %c0_i32_2 = arith.constant 0 : i32
    return %c0_i32, %c0_i32_0, %c0_i32_1 : i32, i32, i32
  }
  func.func @transform_8(%arg0: i32) -> (i32, i32, i32) {
    %c0_i32 = arith.constant 0 : i32
    %c0_i32_0 = arith.constant 0 : i32
    %c0_i32_1 = arith.constant 0 : i32
    %c0_i32_2 = arith.constant 0 : i32
    return %c0_i32, %c0_i32_0, %c0_i32_1 : i32, i32, i32
  }
  func.func @transform_9(%arg0: i32) -> (i32, i32, i32) {
    %c0_i32 = arith.constant 0 : i32
    %c0_i32_0 = arith.constant 0 : i32
    %c0_i32_1 = arith.constant 0 : i32
    %c0_i32_2 = arith.constant 0 : i32
    return %c0_i32, %c0_i32_0, %c0_i32_1 : i32, i32, i32
  }
  func.func @transform_10(%arg0: i32) -> (i32, i32, i32) {
    %c0_i32 = arith.constant 0 : i32
    %c0_i32_0 = arith.constant 0 : i32
    %c0_i32_1 = arith.constant 0 : i32
    %c0_i32_2 = arith.constant 0 : i32
    return %c0_i32, %c0_i32_0, %c0_i32_1 : i32, i32, i32
  }
  func.func @transform_11(%arg0: i32) -> (i32, i32, i32) {
    %c0_i32 = arith.constant 0 : i32
    %c0_i32_0 = arith.constant 0 : i32
    %c0_i32_1 = arith.constant 0 : i32
    %c0_i32_2 = arith.constant 0 : i32
    return %c0_i32, %c0_i32_0, %c0_i32_1 : i32, i32, i32
  }
  func.func @transform_12(%arg0: i32) -> (i32, i32, i32) {
    %c0_i32 = arith.constant 0 : i32
    %c0_i32_0 = arith.constant 0 : i32
    %c0_i32_1 = arith.constant 0 : i32
    %c0_i32_2 = arith.constant 0 : i32
    return %c0_i32, %c0_i32_0, %c0_i32_1 : i32, i32, i32
  }
  func.func @transform_13(%arg0: i32) -> (i32, i32, i32) {
    %c0_i32 = arith.constant 0 : i32
    %c0_i32_0 = arith.constant 0 : i32
    %c0_i32_1 = arith.constant 0 : i32
    %c0_i32_2 = arith.constant 0 : i32
    return %c0_i32, %c0_i32_0, %c0_i32_1 : i32, i32, i32
  }
  func.func @transform_14(%arg0: i32) -> (i32, i32, i32) {
    %c0_i32 = arith.constant 0 : i32
    %c0_i32_0 = arith.constant 0 : i32
    %c0_i32_1 = arith.constant 0 : i32
    %c0_i32_2 = arith.constant 0 : i32
    return %c0_i32, %c0_i32_0, %c0_i32_1 : i32, i32, i32
  }
  func.func @transform_15(%arg0: i32) -> (i32, i32, i32) {
    %c0_i32 = arith.constant 0 : i32
    %c0_i32_0 = arith.constant 0 : i32
    %c0_i32_1 = arith.constant 0 : i32
    %c0_i32_2 = arith.constant 0 : i32
    return %c0_i32, %c0_i32_0, %c0_i32_1 : i32, i32, i32
  }
  func.func @transform_16(%arg0: i32) -> (i32, i32) {
    %c0_i32 = arith.constant 0 : i32
    %c0_i32_0 = arith.constant 0 : i32
    %c0_i32_1 = arith.constant 0 : i32
    return %c0_i32, %c0_i32_0 : i32, i32
  }
  func.func @transform_17(%arg0: i32) -> (i32, i32) {
    %c0_i32 = arith.constant 0 : i32
    %c0_i32_0 = arith.constant 0 : i32
    %c0_i32_1 = arith.constant 0 : i32
    return %c0_i32, %c0_i32_0 : i32, i32
  }
  func.func @transform_18(%arg0: i32) -> (i32, i32) {
    %c0_i32 = arith.constant 0 : i32
    %c0_i32_0 = arith.constant 0 : i32
    %c0_i32_1 = arith.constant 0 : i32
    return %c0_i32, %c0_i32_0 : i32, i32
  }
  func.func @transform_19(%arg0: i32) -> (i32, i32) {
    %c0_i32 = arith.constant 0 : i32
    %c0_i32_0 = arith.constant 0 : i32
    %c0_i32_1 = arith.constant 0 : i32
    return %c0_i32, %c0_i32_0 : i32, i32
  }
  func.func @transform_20(%arg0: i32) -> (i32, i32, i32) {
    %c0_i32 = arith.constant 0 : i32
    %c0_i32_0 = arith.constant 0 : i32
    %c0_i32_1 = arith.constant 0 : i32
    return %arg0, %c0_i32, %c0_i32_0 : i32, i32, i32
  }
}

</mosaic_0001>

<bundles_post_ra>
// kernel: roberta_class_forward.1
= control target key start
LH: loop header
LB: loop body
LE: loop exit
PB: predicated region body
PF: predicated region fallthrough
CT: control target
= control target key end

     0   :  { %s4832_s0 = inlined_call_operand.vmem [shape: f32[2,8,64], index: 0, kind: input, shape index: {}]   ;;  %s4833_s1 = inlined_call_operand.vmem [shape: f32[2,1,8], index: 1, kind: input, shape index: {}]   ;;  %s4834_s2 = inlined_call_operand.vmem [shape: f32[1,64], index: 2, kind: input, shape index: {}]   ;;  %s4835_s3 = inlined_call_operand.vmem [shape: f32[1,64], index: 3, kind: input, shape index: {}]   ;;  %s4836_s4 = inlined_call_operand.vmem [shape: bf16[2,64,192], index: 4, kind: input, shape index: {}]   ;;  %s4837_s5 = inlined_call_operand.vmem [shape: f32[2,1,192], index: 5, kind: input, shape index: {}]   ;;  %s4838_s6 = inlined_call_operand.vmem [shape: bf16[2,64,64], index: 6, kind: input, shape index: {}]   ;;  %s4839_s7 = inlined_call_operand.vmem [shape: f32[2,1,64], index: 7, kind: input, shape index: {}]   ;;  %s4840_s8 = inlined_call_operand.vmem [shape: f32[2,1,64], index: 8, kind: input, shape index: {}]   ;;  %s4841_s9 = inlined_call_operand.vmem [shape: f32[2,1,64], index: 9, kind: input, shape index: {}]   ;;  %s4842_s10 = inlined_call_operand.vmem [shape: bf16[2,64,128], index: 10, kind: input, shape index: {}]   ;;  %s4843_s11 = inlined_call_operand.vmem [shape: f32[2,1,128], index: 11, kind: input, shape index: {}]   ;;  %s4844_s12 = inlined_call_operand.vmem [shape: bf16[2,128,64], index: 12, kind: input, shape index: {}]   ;;  %s4845_s13 = inlined_call_operand.vmem [shape: f32[2,1,64], index: 13, kind: input, shape index: {}]   ;;  %s4846_s14 = inlined_call_operand.vmem [shape: f32[2,1,64], index: 14, kind: input, shape index: {}]   ;;  %s4847_s15 = inlined_call_operand.vmem [shape: f32[2,1,64], index: 15, kind: input, shape index: {}]   ;;  %s4848_s16 = inlined_call_operand.vmem [shape: bf16[64,64], index: 16, kind: input, shape index: {}]   ;;  %s4849_s17 = inlined_call_operand.vmem [shape: f32[1,64], index: 17, kind: input, shape index: {}]   ;;  %s4850_s18 = inlined_call_operand.vmem [shape: bf16[64,128], index: 18, kind: input, shape index: {}]   ;;  %s4851_s19 = inlined_call_operand.vmem [shape: f32[1,128], index: 19, kind: input, shape index: {}]   ;;  %s4852_s20 = inlined_call_operand.hbm [shape: f32[2,1,128], index: 20, kind: output, shape index: {}]  }
   0x1   :  { %4869 = sst [smem:[#allocation11_spill]] %s4832_s0 }
   0x2   :  { %4870 = sst [smem:[#allocation12_spill]] %s4833_s1 }
   0x3   :  { %4871 = sst [smem:[#allocation13_spill]] %s4834_s2 }
   0x4   :  { %4872 = sst [smem:[#allocation14_spill]] %s4835_s3 }
   0x5   :  { %4873 = sst [smem:[#allocation15_spill]] %s4836_s4 }
   0x6   :  { %25 = vsyncpa [#allocation3], 0 }
   0x7   :  { %27 = vsyncpa [#allocation3 + $0x1], 0  ;;  %s4225_s1 = smov 0   ;;  %s4227_s22 = smov 0  }
   0x8   :  { %s4229_s23 = smov 0   ;;  %s4231_s24 = smov 0  }
   0x9 LB: > { %4874 = sst [smem:[#allocation5_spill]] %s4095_s1  ;;  %s4246_s2 = sadd.s32 4294967295, %s4107_s24   ;;  %s4107_s24 = sphi %s4231_s24, %s4896_s24   ;;  %s4103_s23 = sphi %s4229_s23, %s4898_s23   ;;  %s4099_s22 = sphi %s4227_s22, %s4900_s22   ;;  %s4095_s1 = sphi %s4225_s1, %s4899_s1  }
   0xa   : > { %4875 = sst [smem:[#allocation6_spill]] %s4103_s23  ;;  %s3417_s25 = sadd.s32 4294967294, %s4107_s24  }
   0xb   : > { %4876 = sst [smem:[#allocation7_spill]] %s4107_s24  ;;  %s4250_s3 = sadd.s32 1, %s4107_s24  }
   0xc   : > { %4877 = sst [smem:[#allocation8_spill]] %s4250_s3  ;;  %s470_s26 = sadd.s32 1, %s4103_s23 }
   0xd   : > { %s467_s27 = ssub.s32 %s4107_s24, %s4250_s3  ;;  %p480_p0 = scmp.ne.s32.totalorder %s4103_s23, %s4099_s22 }
   0xe   : > { %p468_p1 = scmp.eq.s32.totalorder %s467_s27, 0  ;;  %p481_p2 = scmp.eq.s32.totalorder %s4246_s2, 1 }
   0xf   : > { %p486_p3 = scmp.ne.s32.totalorder %s4099_s22, %s4095_s1  ;;  %p487_p4 = scmp.eq.s32.totalorder %s3417_s25, 1 }
  0x10   : > { %s4261_s28 = scalar_select %p468_p1, %s4103_s23, %s470_s26  }
  0x11   : > { %p4263_p5 = por %p481_p2, %p480_p0  ;;  %p4267_p6 = por %p487_p4, %p486_p3 }
  0x12   : > { %4878 = sst [smem:[#allocation9_spill]] %s4261_s28  ;;  %p3420_p7 = scmp.ge.s32.totalorder %s4107_s24, 1 }
  0x13   : > { %s4880_s29 = scalar_select %p4267_p6, 1, 0 }
  0x14   : > { %p572_p8 = scmp.lt.s32.totalorder %s4107_s24, 3 }
  0x15   : > { %4881 = sst [smem:[#allocation10_spill]] %s4880_s29 }
  0x16   : > { %p573_p9 = pnand %p3420_p7, %p572_p8 }
  0x17   : > { %p631_p10 = scmp.lt.s32.totalorder (!%p573_p9), %s4246_s2, 1  ;;  %vm642_vm0 = vcmask (!%p573_p9), 523264   ;;  %s4882_s26 = sld [smem:[#allocation11_spill]] (!%p573_p9)  ;;  %v4109_v15 = vmov (!%p573_p9), 0   ;;  %v4110_v26 = vmov (!%p573_p9), 0.0   ;;  %v689_v27 = vlaneseq (!%p573_p9)  ;;  %v3947_v57 = vld [vmem:[%s4838_s6] sm:$0xff] (!%p573_p9)  }
  0x18   : > { %576 = sbr.rel (%p573_p9) target bundleno = 8655 (0x21cf), region = 100  ;;  %s4883_s3 = sld [smem:[#allocation15_spill]] (!%p573_p9)  ;;  %774 = vmatprep.mubr.bf16.mxu0 (!%p573_p9), %v4109_v15  ;;  %3670 = vmatprep.subr.mxu1 (!%p573_p9), %v4110_v26  ;;  %vm4111_vm1 = vmmov (!%p573_p9), 0   ;;  %v687_v30 = vld [vmem:[%s4837_s5] sm:$0x3] (!%p573_p9)  ;;  %vm795_vm2 = vcmask (!%p573_p9), 130048  }
  0x19   : > { %s4885_s28 = sld [smem:[#allocation14_spill]] (!%p573_p9)  ;;  %v4321_v28 = vshrl.u32 (!%p573_p9), %v689_v27, 7  ;;  %3672 = vmatprep.mubr.msk.f32.mxu1 (!%p573_p9), %vm4111_vm1, %v4110_v26  ;;  %s4868_s21 = smov (!%p573_p9), 64   ;;  %vm871_vm3 = vcmask (!%p573_p9), 64512  }
  0x1a   : > { %s4866_s23 = smov (!%p573_p9), 112   ;;  %s4865_s1 = smov (!%p573_p9), 32  }
  0x1b   : > { %v691_v29 = vsub.s32 (!%p573_p9), 0, %v4321_v28  ;;  %v695_v37 = vsub.s32 (!%p573_p9), 1, %v4321_v28  ;;  %s4863_s29 = smov (!%p573_p9), 96   ;;  %s4892_s24 = smov (!%p573_p9), 16  }
  0x1d   : > { %v692_v31 = vrot.slane (!%p573_p9), %v687_v30, %v691_v29  ;;  %v696_v38 = vrot.slane (!%p573_p9), %v687_v30, %v695_v37 }
  0x1e   : > { %v3935_v7 = vld [vmem:[%s4883_s3 + $0x4] ss:$8 sps:$4 sm:$0xff] (!%p573_p9)   ;;  %v3937_v8 = vld [vmem:[%s4883_s3] ss:$8 sps:$4 sm:$0xff] (!%p573_p9)   ;;  %v3938_v9 = vld [vmem:[%s4883_s3 + $0x14] ss:$8 sps:$4 sm:$0xff] (!%p573_p9)  }
  0x1f   : > { %s4275_s30 = scalar_select %p631_p10, %s4246_s2, 1  ;;  %742 = vmatprep.subr.bf16.mxu0 %v3935_v7  ;;  %v3940_v10 = vld [vmem:[%s4883_s3 + $0x10] ss:$8 sps:$4 sm:$0xff]   ;;  %v3941_v11 = vld [vmem:[%s4883_s3 + $0x24] ss:$8 sps:$4 sm:$0xff]  }
  0x20   : > { %743 = vmatpush1.bf16.msra.mxu0 %v3937_v8  ;;  %v3943_v12 = vld [vmem:[%s4883_s3 + $0x20] ss:$8 sps:$4 sm:$0xff]   ;;  %v3944_v13 = vld [vmem:[%s4883_s3 + $0x34] ss:$8 sps:$4 sm:$0xff]   ;;  %v3946_v14 = vld [vmem:[%s4883_s3 + $0x30] ss:$8 sps:$4 sm:$0xff]  }
  0x21   : > { %s3421_s0 = sshll.u32 %s4275_s30, 3  ;;  %744 = vmatprep.subr.bf16.mxu0 %v3938_v9  ;;  %v3423_v22 = vld [vmem:[%s4885_s28] ss:$0 sm:$0xff]  ;;  %s4891_s28 = smov 80  }
  0x22   : > { %s634_s27 = scalar_lea.vmem %s4882_s26, %s3421_s0  ;;  %s4884_s26 = sld [smem:[#allocation13_spill]] }
  0x23   : > { %v639_v0 = vld [vmem:[%s634_s27] sm:$0xff]  ;;  %s4112_s0 = smov 48  }
  0x24   : > { %v643_v1 = vsel %vm642_vm0, %v639_v0, 0.0  ;;  %745 = vmatpush1.bf16.msra.mxu0 %v3940_v10 }
  0x25   : > { %644 = vadd.xlane.f32.xlu0 %v643_v1  ;;  %746 = vmatprep.subr.bf16.mxu0 %v3941_v11 }
  0x28   : > { %747 = vmatpush1.bf16.msra.mxu0 %v3943_v12  ;;  %v3422_v20 = vld [vmem:[%s4884_s26] ss:$0 sm:$0xff]  ;;  %s4886_s26 = sld [smem:[#allocation12_spill]] }
  0x29   : > { %748 = vmatprep.subr.bf16.mxu0 %v3944_v13  ;;  %v3948_v13 = vld [vmem:[%s4838_s6 + $0x8] sm:$0xff]  }
  0x2c   : > { %749 = vmatpush1.bf16.msra.mxu0 %v3946_v14 }
  0x2d   : > { %3696 = vmatprep.subr.bf16.mxu0 %v4110_v26 }
  0x2e   : > { %s637_s27 = scalar_lea.vmem %s4886_s26, %s4275_s30  ;;  %s4860_s26 = smov 16  }
  0x2f   : > { %v4359_v42 = vld [vmem:[%s637_s27] ss:$0 sm:$0xff]  ;;  %s4861_s27 = smov 80   ;;  %s3581_s30 = sshll.u32 %s4246_s2, 4 }
  0xb2   : > { %v645_v2 = vpop.xlane.xlu0 %644 }
  0xb3   : > { %v647_v3 = vmul.f32 0.015625, %v645_v2 }
  0xb5   : > { %v648_v4 = vsub.f32 %v639_v0, %v647_v3 }
  0xb7   : > { %v649_v5 = vmul.f32 %v648_v4, %v648_v4 }
  0xb9   : > { %v650_v6 = vsel %vm642_vm0, %v649_v5, 0.0 }
  0xba   : > { %651 = vadd.xlane.f32.xlu0 %v650_v6 }
 0x147   : > { %v652_v16 = vpop.xlane.xlu0 %651 }
 0x148   : > { %v653_v17 = vmul.f32 0.015625, %v652_v16 }
 0x14a   : > { %v654_v18 = vadd.f32 1e-05, %v653_v17 }
 0x14c   : > { %3999 = vrsqrt.f32 %v654_v18 }
 0x156   : > { %v4000_v19 = vpop.eup %3999 }
 0x157   : > { %v656_v21 = vmul.f32 %v4000_v19, %v648_v4 }
 0x159   : > { %v663_v23 = vmul.f32 %v3422_v20, %v656_v21 }
 0x15b   : > { %v4314_v24 = vadd.f32 %v3423_v22, %v663_v23 }
 0x15d   : > { %v686_v25 = vpack.c.bf16 %v4314_v24, %v4314_v24 }
 0x15f   : > { %3433 = vmatmul.mubr.msk.bf16.vlgmr.msra.gmra.mrb[0].mxu0 %vm642_vm0, %v686_v25 }
 0x160   : > { %3698 = vmatprep.mubr.msk.bf16.mxu0 %vm4111_vm1, %v4110_v26  ;;  %3697 = vmatpush3.bf16.msra.mxu0 %v3947_v57 }
 0x161   : > { %3707 = vmatprep.subr.mxu0 %v4110_v26 }
 0x232   : > { %v776_v32 = vpop.f32.mrb[0].mxu0 }
 0x233   : > { %v4333_v33 = vadd.f32 %v776_v32, %v692_v31  ;;  %v778_v34 = vpop.f32.mrb[1].mxu0 }
 0x234   : > { %v780_v35 = vpop.f32.mrb[2].mxu0  ;;  %v4347_v41 = vadd.f32 %v778_v34, %v696_v38 }
 0x235   : > { %v781_v36 = vpop.f32.mrb[3].mxu0  ;;  %959 = vrot.lane.b32.xlu0 %v4333_v33, %s4112_s0  ;;  %793 = vrot.lane.b32.xlu1 %v4333_v33, %s4868_s21  ;;  %v4344_v40 = vmul.f32 0.25, %v4333_v33 }
 0x2a7   : > { %v794_v39 = vpop.permute.xlu1 %793  ;;  %v960_v52 = vpop.permute.xlu0 %959 }
 0x2a8   : > { %3671 = vmatpush3.xpose.msk.msra.mxu1 %vm795_vm2, %v794_v39 }
 0x2a9   : > { %3675 = vmatprep.subr.mxu1 %v4110_v26 }
 0x2ab   : > { %3673 = vmatmul.mubr.msk.f32.vlgmr.msra.gmra.mrb[0].mxu1 %vm795_vm2, %v4344_v40 }
 0x2ac   : > { %3676 = vmatpush3.msra.mxu1 %v4347_v41  ;;  %3677 = vmatprep.mubr.msk.f32.mxu1 %vm4111_vm1, %v4110_v26 }
 0x2ad   : > { %3680 = vmatprep.subr.mxu1 %v4110_v26 }
 0x37e   : > { %v867_v43 = vpop.f32.mrb[0].mxu1 }
 0x37f   : > { %v868_v44 = vadd.f32 %v4359_v42, %v867_v43  ;;  %v3674_v45 = vpop.f32.mrb[1].mxu1 }
 0x381   : > { %v872_v46 = vsel %vm871_vm3, %v868_v44, -inf }
 0x382   : > { %873 = vmax.xlane.f32.xlu1 %v872_v46 }
 0x40f   : > { %v874_v47 = vpop.xlane.xlu1 %873 }
 0x410   : > { %v875_v48 = vsub.f32 %v868_v44, %v874_v47 }
 0x412   : > { %v876_v49 = vmul.f32 1.442695, %v875_v48  ;;  %v3949_v48 = vld [vmem:[%s4838_s6 + $0x10] sm:$0xff]  }
 0x414   : > { %4001 = vpow2.f32 %v876_v49 }
 0x41e   : > { %v4002_v50 = vpop.eup %4001 }
 0x41f   : > { %v878_v51 = vsel %vm871_vm3, %v4002_v50, 0.0 }
 0x420   : > { %879 = vadd.xlane.f32.xlu0 %v878_v51 }
 0x436   : > { %957 = vrot.lane.b32.xlu0 %v4344_v40, %s4866_s23 }
 0x4ad   : > { %v880_v53 = vpop.xlane.xlu0 %879 }
 0x4ae   : > { %4003 = vrcp.f32 %v880_v53 }
 0x4b1   : > { %v958_v56 = vpop.permute.xlu0 %957 }
 0x4b8   : > { %v4004_v54 = vpop.eup %4003 }
 0x4b9   : > { %v882_v55 = vmul.f32 %v4004_v54, %v4002_v50 }
 0x4bb   : > { %3678 = vmatmul.mubr.msk.f32.vlgmr.msra.gmra.mrb[2].mxu1 %vm871_vm3, %v882_v55 }
 0x4bc   : > { %3681 = vmatpush3.xpose.msk.msra.mxu1 %vm795_vm2, %v960_v52  ;;  %3682 = vmatprep.mubr.msk.f32.mxu1 %vm4111_vm1, %v4110_v26 }
 0x4bd   : > { %3685 = vmatprep.subr.mxu1 %v4110_v26 }
 0x4bf   : > { %3683 = vmatmul.mubr.msk.f32.vlgmr.msra.gmra.mrb[4].mxu1 %vm795_vm2, %v958_v56 }
 0x4c0   : > { %3687 = vmatprep.mubr.msk.f32.mxu1 %vm4111_vm1, %v4110_v26 }
 0x58e   : > { %v952_v58 = vpop.f32.mrb[2].mxu1 }
 0x58f   : > { %v956_v59 = vpack.c.bf16 %v952_v58, %v952_v58  ;;  %v3679_v60 = vpop.f32.mrb[3].mxu1 }
 0x591   : > { %3699 = vmatmul.mubr.msk.bf16.vlgmr.msra.gmra.mrb[4].mxu0 %vm795_vm2, %v956_v59 }
 0x592   : > { %v1031_v61 = vpop.f32.mrb[4].mxu1  ;;  %3709 = vmatprep.mubr.msk.f32.mxu0 %vm4111_vm1, %v4110_v26 }
 0x593   : > { %v1032_v62 = vadd.f32 %v4359_v42, %v1031_v61  ;;  %v3684_v63 = vpop.f32.mrb[5].mxu1 }
 0x595   : > { %v1035_v0 = vsel %vm871_vm3, %v1032_v62, -inf }
 0x596   : > { %1036 = vmax.xlane.f32.xlu0 %v1035_v0 }
 0x623   : > { %v1037_v1 = vpop.xlane.xlu0 %1036 }
 0x624   : > { %v1038_v2 = vsub.f32 %v1032_v62, %v1037_v1 }
 0x626   : > { %v1039_v3 = vmul.f32 1.442695, %v1038_v2 }
 0x628   : > { %4005 = vpow2.f32 %v1039_v3 }
 0x632   : > { %v4006_v4 = vpop.eup %4005 }
 0x633   : > { %v1041_v5 = vsel %vm871_vm3, %v4006_v4, 0.0 }
 0x634   : > { %1042 = vadd.xlane.f32.xlu1 %v1041_v5 }
 0x645   : > { %1047 = vrot.lane.b32.xlu1 %v4347_v41, %s4866_s23 }
 0x649   : > { %1224 = vrot.lane.b32.xlu1 %v4333_v33, %s4865_s1  ;;  %s4890_s1 = smov 96  }
 0x64d   : > { %1222 = vrot.lane.b32.xlu1 %v4344_v40, %s4863_s29 }
 0x664   : > { %v1216_v6 = vpop.f32.mrb[4].mxu0 }
 0x665   : > { %v3700_v7 = vpop.f32.mrb[5].mxu0 }
 0x666   : > { %v1219_v8 = vpop.f32.mrb[6].mxu0 }
 0x667   : > { %v3701_v9 = vpop.f32.mrb[7].mxu0 }
 0x6c1   : > { %v1043_v10 = vpop.xlane.xlu1 %1042 }
 0x6c2   : > { %4007 = vrcp.f32 %v1043_v10  ;;  %v3454_v10 = vld [vmem:[%s4839_s7] ss:$0 sm:$0xff] }
 0x6c5   : > { %v1048_v11 = vpop.permute.xlu1 %1047 }
 0x6c6   : > { %3686 = vmatpush3.msra.mxu1 %v1048_v11 }
 0x6c7   : > { %3690 = vmatprep.subr.bf16.mxu1 %v4110_v26 }
 0x6c9   : > { %v1225_v19 = vpop.permute.xlu1 %1224 }
 0x6cc   : > { %v4008_v12 = vpop.eup %4007 }
 0x6cd   : > { %v1045_v14 = vmul.f32 %v4008_v12, %v4006_v4  ;;  %v1223_v20 = vpop.permute.xlu1 %1222 }
 0x6cf   : > { %3688 = vmatmul.mubr.msk.f32.vlgmr.msra.gmra.mrb[6].mxu1 %vm871_vm3, %v1045_v14 }
 0x6d0   : > { %3691 = vmatpush3.bf16.msra.mxu1 %v3948_v13  ;;  %3692 = vmatprep.mubr.msk.bf16.mxu1 %vm4111_vm1, %v4110_v26 }
 0x6d1   : > { %3702 = vmatprep.subr.mxu1 %v4110_v26 }
 0x7a2   : > { %v1119_v16 = vpop.f32.mrb[6].mxu1 }
 0x7a3   : > { %v1123_v17 = vpack.c.bf16 %v1119_v16, %v1119_v16  ;;  %v3689_v18 = vpop.f32.mrb[7].mxu1 }
 0x7a5   : > { %3693 = vmatmul.mubr.msk.bf16.vlgmr.msra.gmra.mrb[8].mxu1 %vm795_vm2, %v1123_v17 }
 0x7a6   : > { %3703 = vmatpush3.xpose.msk.msra.mxu1 %vm795_vm2, %v1225_v19  ;;  %3704 = vmatprep.mubr.msk.f32.mxu1 %vm4111_vm1, %v4110_v26 }
 0x7a7   : > { %3712 = vmatprep.subr.bf16.mxu1 %v4110_v26 }
 0x7ad   : > { %3705 = vmatmul.mubr.msk.f32.vlgmr.msra.gmra.mrb[12].mxu1 %vm795_vm2, %v1223_v20 }
 0x7ae   : > { %3714 = vmatprep.mubr.msk.bf16.mxu1 %vm4111_vm1, %v4110_v26  ;;  %3713 = vmatpush3.bf16.msra.mxu1 %v3949_v48  ;;  %v3960_v48 = vld [vmem:[%s4844_s12 + $0x28] sm:$0xff]  }
 0x7af   : > { %3746 = vmatprep.subr.bf16.mxu1 %v4110_v26 }
 0x878   : > { %v1167_v21 = vpop.f32.mrb[8].mxu1 }
 0x879   : > { %v1217_v22 = vadd.f32 %v1216_v6, %v1167_v21  ;;  %v3694_v23 = vpop.f32.mrb[9].mxu1 }
 0x87a   : > { %v1170_v25 = vpop.f32.mrb[10].mxu1 }
 0x87b   : > { %v3695_v27 = vpop.f32.mrb[11].mxu1  ;;  %v3951_v25 = vld [vmem:[%s4842_s10] sm:$0xff]  }
 0x87c   : > { %v3953_v27 = vld [vmem:[%s4842_s10 + $0x10] sm:$0xff]  }
 0x880   : > { %v1296_v30 = vpop.f32.mrb[12].mxu1 }
 0x881   : > { %v1297_v31 = vadd.f32 %v4359_v42, %v1296_v30  ;;  %v3706_v32 = vpop.f32.mrb[13].mxu1  ;;  %v3954_v30 = vld [vmem:[%s4842_s10 + $0x18] sm:$0xff]  }
 0x883   : > { %v1300_v34 = vsel %vm871_vm3, %v1297_v31, -inf }
 0x884   : > { %1301 = vmax.xlane.f32.xlu0 %v1300_v34 }
 0x89a   : > { %1311 = vrot.lane.b32.xlu0 %v4347_v41, %s4863_s29  ;;  %s629_s29 = sand.u32 1, %s4099_s22  }
 0x89e   : > { %1440 = vrot.lane.b32.xlu0 %v4333_v33, %s4860_s26  ;;  %s4887_s26 = smov 64  }
 0x8a2   : > { %1438 = vrot.lane.b32.xlu0 %v4344_v40, %s4861_s27 }
 0x911   : > { %v1302_v35 = vpop.xlane.xlu0 %1301 }
 0x912   : > { %v1303_v36 = vsub.f32 %v1297_v31, %v1302_v35  ;;  %v3955_v31 = vld [vmem:[%s4844_s12] sm:$0xff]  }
 0x914   : > { %v1304_v38 = vmul.f32 1.442695, %v1303_v36 }
 0x915   : > { %v1312_v39 = vpop.permute.xlu0 %1311 }
 0x916   : > { %4009 = vpow2.f32 %v1304_v38  ;;  %3708 = vmatpush3.msra.mxu0 %v1312_v39  ;;  %v3455_v38 = vld [vmem:[%s4840_s8] ss:$0 sm:$0xff] }
 0x917   : > { %3718 = vmatprep.subr.mxu0 %v4110_v26 }
 0x919   : > { %v1441_v33 = vpop.permute.xlu0 %1440 }
 0x91d   : > { %v1439_v40 = vpop.permute.xlu0 %1438 }
 0x920   : > { %v4010_v43 = vpop.eup %4009 }
 0x921   : > { %v1306_v44 = vsel %vm871_vm3, %v4010_v43, 0.0 }
 0x922   : > { %1307 = vadd.xlane.f32.xlu1 %v1306_v44 }
 0x9af   : > { %v1308_v45 = vpop.xlane.xlu1 %1307 }
 0x9b0   : > { %4011 = vrcp.f32 %v1308_v45 }
 0x9ba   : > { %v4012_v46 = vpop.eup %4011 }
 0x9bb   : > { %v1310_v47 = vmul.f32 %v4012_v46, %v4010_v43  ;;  %v3456_v43 = vld [vmem:[%s4841_s9] ss:$0 sm:$0xff] }
 0x9bd   : > { %3710 = vmatmul.mubr.msk.f32.vlgmr.msra.gmra.mrb[8].mxu0 %vm871_vm3, %v1310_v47  ;;  %v3957_v47 = vld [vmem:[%s4844_s12 + $0x10] sm:$0xff]  }
 0x9be   : > { %3719 = vmatpush3.xpose.msk.msra.mxu0 %vm795_vm2, %v1441_v33  ;;  %3720 = vmatprep.mubr.msk.f32.mxu0 %vm4111_vm1, %v4110_v26  ;;  %v3956_v33 = vld [vmem:[%s4844_s12 + $0x8] sm:$0xff]  }
 0x9bf   : > { %3723 = vmatprep.subr.mxu0 %v4110_v26 }
 0x9c1   : > { %3721 = vmatmul.mubr.msk.f32.vlgmr.msra.gmra.mrb[10].mxu0 %vm795_vm2, %v1439_v40  ;;  %v3958_v40 = vld [vmem:[%s4844_s12 + $0x18] sm:$0xff]  }
 0x9c2   : > { %3725 = vmatprep.mubr.msk.f32.mxu0 %vm4111_vm1, %v4110_v26 }
 0xa90   : > { %v1383_v49 = vpop.f32.mrb[8].mxu0 }
 0xa91   : > { %v1387_v50 = vpack.c.bf16 %v1383_v49, %v1383_v49  ;;  %v3711_v51 = vpop.f32.mrb[9].mxu0  ;;  %v3961_v49 = vld [vmem:[%s4844_s12 + $0x30] sm:$0xff]  }
 0xa92   : > { %v3457_v51 = vld [vmem:[%s4843_s11] ss:$0 sm:$0xff] }
 0xa93   : > { %3715 = vmatmul.mubr.msk.bf16.vlgmr.msra.gmra.mrb[16].mxu1 %vm795_vm2, %v1387_v50  ;;  %v3962_v50 = vld [vmem:[%s4844_s12 + $0x38] sm:$0xff]  }
 0xa94   : > { %v1512_v52 = vpop.f32.mrb[10].mxu0  ;;  %3762 = vmatprep.mubr.msk.bf16.mxu1 %vm4111_vm1, %v4110_v26  ;;  %3747 = vmatpush3.bf16.msra.mxu1 %v3955_v31  ;;  %v3472_v31 = vld [vmem:[%s4846_s14] ss:$0 sm:$0xff] }
 0xa95   : > { %v1513_v53 = vadd.f32 %v4359_v42, %v1512_v52  ;;  %v3722_v54 = vpop.f32.mrb[11].mxu0  ;;  %3748 = vmatprep.subr.bf16.mxu1 %v4110_v26 }
 0xa97   : > { %v1516_v55 = vsel %vm871_vm3, %v1513_v53, -inf }
 0xa98   : > { %1517 = vmax.xlane.f32.xlu0 %v1516_v55  ;;  %3749 = vmatpush3.bf16.msra.mxu1 %v3956_v33 }
 0xa99   : > { %3750 = vmatprep.subr.bf16.mxu1 %v4110_v26 }
 0xa9c   : > { %3751 = vmatpush3.bf16.msra.mxu1 %v3957_v47 }
 0xa9d   : > { %3752 = vmatprep.subr.bf16.mxu1 %v4110_v26 }
 0xaa0   : > { %3753 = vmatpush3.bf16.msra.mxu1 %v3958_v40 }
 0xaa1   : > { %3754 = vmatprep.subr.bf16.mxu1 %v4110_v26 }
 0xb25   : > { %v1518_v56 = vpop.xlane.xlu0 %1517 }
 0xb26   : > { %v1519_v57 = vsub.f32 %v1513_v53, %v1518_v56 }
 0xb28   : > { %v1520_v58 = vmul.f32 1.442695, %v1519_v57 }
 0xb2a   : > { %4013 = vpow2.f32 %v1520_v58 }
 0xb34   : > { %v4014_v59 = vpop.eup %4013 }
 0xb35   : > { %v1522_v60 = vsel %vm871_vm3, %v4014_v59, 0.0 }
 0xb36   : > { %1523 = vadd.xlane.f32.xlu1 %v1522_v60 }
 0xb47   : > { %1527 = vrot.lane.b32.xlu1 %v4347_v41, %s4861_s27  ;;  %v3950_v41 = vld [vmem:[%s4838_s6 + $0x18] sm:$0xff]   ;;  %s4888_s27 = smov 112  }
 0xb66   : > { %v1431_v61 = vpop.f32.mrb[16].mxu1 }
 0xb67   : > { %v1437_v62 = vadd.f32 %v1431_v61, %v1217_v22  ;;  %v3716_v63 = vpop.f32.mrb[17].mxu1 }
 0xb68   : > { %v1434_v0 = vpop.f32.mrb[18].mxu1 }
 0xb69   : > { %v3717_v1 = vpop.f32.mrb[19].mxu1 }
 0xbc3   : > { %v1524_v2 = vpop.xlane.xlu1 %1523 }
 0xbc4   : > { %4015 = vrcp.f32 %v1524_v2 }
 0xbc7   : > { %v1528_v3 = vpop.permute.xlu1 %1527 }
 0xbc8   : > { %3724 = vmatpush3.msra.mxu0 %v1528_v3  ;;  %v3463_v3 = vld [vmem:[%s4845_s13] ss:$0 sm:$0xff] }
 0xbc9   : > { %3728 = vmatprep.subr.bf16.mxu0 %v4110_v26 }
 0xbce   : > { %v4016_v4 = vpop.eup %4015 }
 0xbcf   : > { %v1526_v5 = vmul.f32 %v4016_v4, %v4014_v59 }
 0xbd1   : > { %3726 = vmatmul.mubr.msk.f32.vlgmr.msra.gmra.mrb[12].mxu0 %vm871_vm3, %v1526_v5 }
 0xbd2   : > { %3730 = vmatprep.mubr.msk.bf16.mxu0 %vm4111_vm1, %v4110_v26  ;;  %3729 = vmatpush3.bf16.msra.mxu0 %v3950_v41 }
 0xbd3   : > { %3734 = vmatprep.subr.bf16.mxu0 %v4110_v26 }
 0xca4   : > { %v1599_v6 = vpop.f32.mrb[12].mxu0 }
 0xca5   : > { %v1603_v7 = vpack.c.bf16 %v1599_v6, %v1599_v6  ;;  %v3727_v8 = vpop.f32.mrb[13].mxu0 }
 0xca7   : > { %3731 = vmatmul.mubr.msk.bf16.vlgmr.msra.gmra.mrb[16].mxu0 %vm795_vm2, %v1603_v7 }
 0xca8   : > { %3742 = vmatprep.mubr.msk.bf16.mxu0 %vm4111_vm1, %v4110_v26  ;;  %3735 = vmatpush3.bf16.msra.mxu0 %v3951_v25 }
 0xca9   : > { %3736 = vmatprep.subr.bf16.mxu0 %v4110_v26 }
 0xd7a   : > { %v1647_v9 = vpop.f32.mrb[16].mxu0 }
 0xd7b   : > { %v1653_v11 = vadd.f32 %v1647_v9, %v1437_v62  ;;  %v3732_v12 = vpop.f32.mrb[17].mxu0 }
 0xd7c   : > { %v1650_v13 = vpop.f32.mrb[18].mxu0 }
 0xd7d   : > { %v1661_v14 = vadd.f32 %v3454_v10, %v1653_v11  ;;  %v3733_v16 = vpop.f32.mrb[19].mxu0 }
 0xd7e   : > { %v3965_v16 = vld [vmem:[%s4883_s3 + $0x44] ss:$8 sps:$4 sm:$0xff]  }
 0xd7f   : > { %v1662_v17 = vadd.f32 %v1661_v14, %v4314_v24  ;;  %v3952_v24 = vld [vmem:[%s4842_s10 + $0x8] sm:$0xff]  }
 0xd80   : > { %3737 = vmatpush3.bf16.msra.mxu0 %v3952_v24 }
 0xd81   : > { %v1665_v18 = vsel %vm642_vm0, %v1662_v17, 0.0  ;;  %3738 = vmatprep.subr.bf16.mxu0 %v4110_v26 }
 0xd82   : > { %1666 = vadd.xlane.f32.xlu1 %v1665_v18  ;;  %v3968_v18 = vld [vmem:[%s4883_s3 + $0x54] ss:$8 sps:$4 sm:$0xff]  }
 0xd84   : > { %3739 = vmatpush3.bf16.msra.mxu0 %v3953_v27 }
 0xd85   : > { %3740 = vmatprep.subr.bf16.mxu0 %v4110_v26 }
 0xd88   : > { %3741 = vmatpush3.bf16.msra.mxu0 %v3954_v30 }
 0xd89   : > { %1992 = vmatprep.subr.bf16.mxu0 %v3965_v16 }
 0xe0f   : > { %v1667_v19 = vpop.xlane.xlu1 %1666 }
 0xe10   : > { %v1668_v20 = vmul.f32 0.015625, %v1667_v19  ;;  %v3966_v19 = vld [vmem:[%s4883_s3 + $0x50] ss:$8 sps:$4 sm:$0xff]  }
 0xe12   : > { %v1669_v21 = vsub.f32 %v1662_v17, %v1668_v20  ;;  %v3963_v17 = vld [vmem:[%s4883_s3 + $0x40] ss:$8 sps:$4 sm:$0xff]   ;;  %v3971_v20 = vld [vmem:[%s4883_s3 + $0x64] ss:$8 sps:$4 sm:$0xff]  }
 0xe14   : > { %v1670_v22 = vmul.f32 %v1669_v21, %v1669_v21 }
 0xe16   : > { %v1671_v23 = vsel %vm642_vm0, %v1670_v22, 0.0  ;;  %v3972_v22 = vld [vmem:[%s4883_s3 + $0x70] ss:$8 sps:$4 sm:$0xff]  }
 0xe17   : > { %1672 = vadd.xlane.f32.xlu0 %v1671_v23  ;;  %v3974_v23 = vld [vmem:[%s4883_s3 + $0x74] ss:$8 sps:$4 sm:$0xff]  }
 0xea4   : > { %v1673_v32 = vpop.xlane.xlu0 %1672 }
 0xea5   : > { %v1674_v34 = vmul.f32 0.015625, %v1673_v32 }
 0xea7   : > { %v1675_v35 = vadd.f32 1e-05, %v1674_v34  ;;  %v3473_v34 = vld [vmem:[%s4847_s15] ss:$0 sm:$0xff] }
 0xea9   : > { %4017 = vrsqrt.f32 %v1675_v35 }
 0xeb3   : > { %v4018_v36 = vpop.eup %4017 }
 0xeb4   : > { %v1677_v39 = vmul.f32 %v4018_v36, %v1669_v21  ;;  %v3969_v21 = vld [vmem:[%s4883_s3 + $0x60] ss:$8 sps:$4 sm:$0xff]  }
 0xeb6   : > { %v1684_v44 = vmul.f32 %v3455_v38, %v1677_v39  ;;  %v3482_v39 = vld [vmem:[%s4837_s5 + $0x2] sm:$0x3] }
 0xeb8   : > { %v1691_v45 = vadd.f32 %v3456_v43, %v1684_v44  ;;  %v1942_v43 = vrot.slane %v3482_v39, %v691_v29  ;;  %v1946_v44 = vrot.slane %v3482_v39, %v695_v37 }
 0xeba   : > { %v1700_v46 = vpack.c.bf16 %v1691_v45, %v1691_v45 }
 0xebc   : > { %3743 = vmatmul.mubr.msk.bf16.vlgmr.msra.gmra.mrb[20].mxu0 %vm642_vm0, %v1700_v46 }
 0xebd   : > { %2024 = vmatprep.mubr.bf16.mxu0 %v4109_v15  ;;  %v3959_v15 = vld [vmem:[%s4844_s12 + $0x20] sm:$0xff]   ;;  %1993 = vmatpush1.bf16.msra.mxu0 %v3963_v17 }
 0xebe   : > { %3755 = vmatpush3.bf16.msra.mxu1 %v3959_v15  ;;  %1994 = vmatprep.subr.bf16.mxu0 %v3968_v18 }
 0xebf   : > { %3756 = vmatprep.subr.bf16.mxu1 %v4110_v26 }
 0xec1   : > { %1995 = vmatpush1.bf16.msra.mxu0 %v3966_v19 }
 0xec2   : > { %3757 = vmatpush3.bf16.msra.mxu1 %v3960_v48  ;;  %1996 = vmatprep.subr.bf16.mxu0 %v3971_v20 }
 0xec3   : > { %3758 = vmatprep.subr.bf16.mxu1 %v4110_v26 }
 0xec5   : > { %1997 = vmatpush1.bf16.msra.mxu0 %v3969_v21 }
 0xec6   : > { %3759 = vmatpush3.bf16.msra.mxu1 %v3961_v49  ;;  %1998 = vmatprep.subr.bf16.mxu0 %v3974_v23 }
 0xec7   : > { %3760 = vmatprep.subr.bf16.mxu1 %v4110_v26 }
 0xec9   : > { %1999 = vmatpush1.bf16.msra.mxu0 %v3972_v22 }
 0xeca   : > { %3761 = vmatpush3.bf16.msra.mxu1 %v3962_v50  ;;  %3766 = vmatprep.subr.mxu0 %v4110_v26 }
 0xecb   : > { %3771 = vmatprep.subr.mxu1 %v4110_v26 }
 0xf8f   : > { %v1769_v52 = vpop.f32.mrb[20].mxu0 }
 0xf90   : > { %v1770_v53 = vadd.f32 %v3457_v51, %v1769_v52  ;;  %v3744_v54 = vpop.f32.mrb[21].mxu0 }
 0xf91   : > { %v1772_v55 = vpop.f32.mrb[22].mxu0 }
 0xf92   : > { %v1776_v56 = vmul.f32 0.044715, %v1770_v53  ;;  %v3745_v57 = vpop.f32.mrb[23].mxu0  ;;  %v1775_v63 = vmul.f32 0.5, %v1770_v53 }
 0xf94   : > { %v1777_v58 = vmul.f32 %v1776_v56, %v1770_v53 }
 0xf96   : > { %v1778_v59 = vmul.f32 %v1777_v58, %v1770_v53 }
 0xf98   : > { %v1779_v60 = vadd.f32 %v1778_v59, %v1770_v53 }
 0xf9a   : > { %v1780_v61 = vmul.f32 0.7978846, %v1779_v60 }
 0xf9c   : > { %4019 = vtanh.f32 %v1780_v61 }
 0xfa6   : > { %v4020_v62 = vpop.eup %4019 }
 0xfa7   : > { %v1782_v0 = vadd.f32 1.0, %v4020_v62 }
 0xfa9   : > { %v1783_v1 = vmul.f32 %v1782_v0, %v1775_v63 }
 0xfab   : > { %v1800_v2 = vpack.c.bf16 %v1783_v1, %v1783_v1 }
 0xfad   : > { %3763 = vmatmul.mubr.bf16.vlgmr.msra.gmra.mrb[20].mxu1 %v1800_v2 }
 0xfae   : > { %3773 = vmatprep.mubr.msk.f32.mxu1 %vm4111_vm1, %v4110_v26 }
0x1080   : > { %v1890_v4 = vpop.f32.mrb[20].mxu1 }
0x1081   : > { %v1891_v5 = vadd.f32 %v3463_v3, %v1890_v4  ;;  %v3764_v41 = vpop.f32.mrb[21].mxu1  ;;  %v3975_v3 = vld [vmem:[%s4838_s6 + $0x28] sm:$0xff]  }
0x1082   : > { %v1893_v6 = vpop.f32.mrb[22].mxu1 }
0x1083   : > { %v3765_v7 = vpop.f32.mrb[23].mxu1  ;;  %v1896_v8 = vadd.f32 %v1891_v5, %v1691_v45 }
0x1085   : > { %v1899_v9 = vsel %vm642_vm0, %v1896_v8, 0.0 }
0x1086   : > { %1900 = vadd.xlane.f32.xlu0 %v1899_v9 }
0x1113   : > { %v1901_v10 = vpop.xlane.xlu0 %1900 }
0x1114   : > { %v1902_v11 = vmul.f32 0.015625, %v1901_v10  ;;  %v3976_v10 = vld [vmem:[%s4838_s6 + $0x20] sm:$0xff]  }
0x1116   : > { %v1903_v12 = vsub.f32 %v1896_v8, %v1902_v11 }
0x1118   : > { %v1904_v13 = vmul.f32 %v1903_v12, %v1903_v12 }
0x111a   : > { %v1905_v14 = vsel %vm642_vm0, %v1904_v13, 0.0 }
0x111b   : > { %1906 = vadd.xlane.f32.xlu0 %v1905_v14 }
0x11a8   : > { %v1907_v25 = vpop.xlane.xlu0 %1906 }
0x11a9   : > { %v1908_v24 = vmul.f32 0.015625, %v1907_v25 }
0x11ab   : > { %v1909_v27 = vadd.f32 1e-05, %v1908_v24 }
0x11ad   : > { %4021 = vrsqrt.f32 %v1909_v27 }
0x11b7   : > { %v4022_v30 = vpop.eup %4021 }
0x11b8   : > { %v1911_v32 = vmul.f32 %v4022_v30, %v1903_v12 }
0x11ba   : > { %v1918_v35 = vmul.f32 %v3472_v31, %v1911_v32 }
0x11bc   : > { %v4549_v36 = vadd.f32 %v3473_v34, %v1918_v35 }
0x11be   : > { %v1935_v38 = vpack.c.bf16 %v4549_v36, %v4549_v36 }
0x11c0   : > { %3491 = vmatmul.mubr.msk.bf16.vlgmr.msra.gmra.mrb[24].mxu0 %vm642_vm0, %v1935_v38 }
0x11c1   : > { %3768 = vmatprep.mubr.msk.f32.mxu0 %vm4111_vm1, %v4110_v26 }
0x1293   : > { %v2026_v45 = vpop.f32.mrb[24].mxu0 }
0x1294   : > { %v4563_v46 = vadd.f32 %v2026_v45, %v1942_v43  ;;  %v2028_v33 = vpop.f32.mrb[25].mxu0 }
0x1295   : > { %v4565_v47 = vadd.f32 %v2028_v33, %v1946_v44  ;;  %v2030_v40 = vpop.f32.mrb[26].mxu0 }
0x1296   : > { %v2031_v15 = vpop.f32.mrb[27].mxu0  ;;  %2208 = vrot.lane.b32.xlu1 %v4563_v46, %s4112_s0  ;;  %2044 = vrot.lane.b32.xlu0 %v4563_v46, %s4887_s26  ;;  %v4573_v29 = vmul.f32 0.25, %v4563_v46  ;;  %s4889_s0 = smov 32  }
0x1297   : > { %3772 = vmatpush3.msra.mxu1 %v4565_v47 }
0x1298   : > { %3781 = vmatprep.subr.mxu1 %v4110_v26 }
0x129a   : > { %2206 = vrot.lane.b32.xlu0 %v4573_v29, %s4888_s27 }
0x1308   : > { %v2045_v28 = vpop.permute.xlu0 %2044  ;;  %v2209_v37 = vpop.permute.xlu1 %2208 }
0x1309   : > { %3767 = vmatpush3.xpose.msk.msra.mxu0 %vm795_vm2, %v2045_v28 }
0x130a   : > { %3776 = vmatprep.subr.mxu0 %v4110_v26 }
0x130c   : > { %3769 = vmatmul.mubr.msk.f32.vlgmr.msra.gmra.mrb[14].mxu0 %vm795_vm2, %v4573_v29  ;;  %v2207_v48 = vpop.permute.xlu0 %2206 }
0x130d   : > { %3777 = vmatpush3.xpose.msk.msra.mxu0 %vm795_vm2, %v2209_v37  ;;  %3778 = vmatprep.mubr.msk.f32.mxu0 %vm4111_vm1, %v4110_v26 }
0x130e   : > { %3786 = vmatprep.subr.bf16.mxu0 %v4110_v26 }
0x1310   : > { %3779 = vmatmul.mubr.msk.f32.vlgmr.msra.gmra.mrb[28].mxu0 %vm795_vm2, %v2207_v48 }
0x1311   : > { %3788 = vmatprep.mubr.msk.bf16.mxu0 %vm4111_vm1, %v4110_v26  ;;  %3787 = vmatpush3.bf16.msra.mxu0 %v3975_v3 }
0x1312   : > { %3798 = vmatprep.subr.mxu0 %v4110_v26 }
0x13df   : > { %v2117_v49 = vpop.f32.mrb[14].mxu0 }
0x13e0   : > { %v2118_v50 = vadd.f32 %v4359_v42, %v2117_v49  ;;  %v3770_v51 = vpop.f32.mrb[15].mxu0 }
0x13e2   : > { %v2121_v52 = vsel %vm871_vm3, %v2118_v50, -inf }
0x13e3   : > { %2122 = vmax.xlane.f32.xlu0 %v2121_v52  ;;  %v2280_v53 = vpop.f32.mrb[28].mxu0 }
0x13e4   : > { %v2281_v54 = vadd.f32 %v4359_v42, %v2280_v53  ;;  %v3780_v55 = vpop.f32.mrb[29].mxu0 }
0x13e6   : > { %v2284_v56 = vsel %vm871_vm3, %v2281_v54, -inf }
0x13e7   : > { %2285 = vmax.xlane.f32.xlu1 %v2284_v56 }
0x13f8   : > { %2473 = vrot.lane.b32.xlu1 %v4563_v46, %s4889_s0  ;;  %s3341_s0 = scalar_lea.sflag [#allocation3], %s629_s29 }
0x13fc   : > { %2471 = vrot.lane.b32.xlu1 %v4573_v29, %s4890_s1 }
0x1470   : > { %v2123_v57 = vpop.xlane.xlu0 %2122 }
0x1471   : > { %v2124_v58 = vsub.f32 %v2118_v50, %v2123_v57 }
0x1473   : > { %v2125_v59 = vmul.f32 1.442695, %v2124_v58 }
0x1474   : > { %v2286_v60 = vpop.xlane.xlu1 %2285 }
0x1475   : > { %4023 = vpow2.f32 %v2125_v59  ;;  %v2287_v61 = vsub.f32 %v2281_v54, %v2286_v60 }
0x1477   : > { %v2288_v62 = vmul.f32 1.442695, %v2287_v61 }
0x1478   : > { %v2474_v18 = vpop.permute.xlu1 %2473 }
0x1479   : > { %4025 = vpow2.f32 %v2288_v62 }
0x147c   : > { %v2472_v19 = vpop.permute.xlu1 %2471 }
0x147f   : > { %v4024_v63 = vpop.eup %4023 }
0x1480   : > { %v2127_v0 = vsel %vm871_vm3, %v4024_v63, 0.0 }
0x1481   : > { %2128 = vadd.xlane.f32.xlu0 %v2127_v0 }
0x1483   : > { %v4026_v1 = vpop.eup %4025 }
0x1484   : > { %v2290_v2 = vsel %vm871_vm3, %v4026_v1, 0.0 }
0x1485   : > { %2291 = vadd.xlane.f32.xlu0 %v2290_v2 }
0x149b   : > { %2296 = vrot.lane.b32.xlu0 %v4565_v47, %s4888_s27  ;;  %s4790_s27 = scalar_lea.hbm %s4852_s20, %s3581_s30 }
0x150e   : > { %v2129_v4 = vpop.xlane.xlu0 %2128 }
0x150f   : > { %4027 = vrcp.f32 %v2129_v4 }
0x1512   : > { %v2292_v5 = vpop.xlane.xlu0 %2291 }
0x1513   : > { %4029 = vrcp.f32 %v2292_v5 }
0x1516   : > { %v2297_v7 = vpop.permute.xlu0 %2296 }
0x1519   : > { %v4028_v41 = vpop.eup %4027 }
0x151a   : > { %v2131_v6 = vmul.f32 %v4028_v41, %v4024_v63 }
0x151c   : > { %3774 = vmatmul.mubr.msk.f32.vlgmr.msra.gmra.mrb[14].mxu1 %vm871_vm3, %v2131_v6 }
0x151d   : > { %v4030_v8 = vpop.eup %4029  ;;  %3782 = vmatpush3.msra.mxu1 %v2297_v7  ;;  %3783 = vmatprep.mubr.msk.f32.mxu1 %vm4111_vm1, %v4110_v26 }
0x151e   : > { %v2294_v9 = vmul.f32 %v4030_v8, %v4026_v1  ;;  %3792 = vmatprep.subr.bf16.mxu1 %v4110_v26  ;;  %v3521_v8 = vld [vmem:[%s4839_s7 + $0x1] ss:$0 sm:$0xff] }
0x1520   : > { %3784 = vmatmul.mubr.msk.f32.vlgmr.msra.gmra.mrb[24].mxu1 %vm871_vm3, %v2294_v9 }
0x1521   : > { %3794 = vmatprep.mubr.msk.bf16.mxu1 %vm4111_vm1, %v4110_v26  ;;  %3793 = vmatpush3.bf16.msra.mxu1 %v3976_v10 }
0x1522   : > { %3803 = vmatprep.subr.mxu1 %v4110_v26 }
0x15ef   : > { %v2201_v11 = vpop.f32.mrb[14].mxu1 }
0x15f0   : > { %v2205_v12 = vpack.c.bf16 %v2201_v11, %v2201_v11  ;;  %v3775_v13 = vpop.f32.mrb[15].mxu1 }
0x15f2   : > { %3795 = vmatmul.mubr.msk.bf16.vlgmr.msra.gmra.mrb[28].mxu1 %vm795_vm2, %v2205_v12 }
0x15f3   : > { %v2368_v14 = vpop.f32.mrb[24].mxu1  ;;  %3805 = vmatprep.mubr.msk.f32.mxu1 %vm4111_vm1, %v4110_v26 }
0x15f4   : > { %v2372_v16 = vpack.c.bf16 %v2368_v14, %v2368_v14  ;;  %v3785_v17 = vpop.f32.mrb[25].mxu1 }
0x15f6   : > { %3789 = vmatmul.mubr.msk.bf16.vlgmr.msra.gmra.mrb[32].mxu0 %vm795_vm2, %v2372_v16 }
0x15f7   : > { %3799 = vmatpush3.xpose.msk.msra.mxu0 %vm795_vm2, %v2474_v18  ;;  %3800 = vmatprep.mubr.msk.f32.mxu0 %vm4111_vm1, %v4110_v26 }
0x15f8   : > { %3808 = vmatprep.subr.bf16.mxu0 %v4110_v26 }
0x15fe   : > { %3801 = vmatmul.mubr.msk.f32.vlgmr.msra.gmra.mrb[30].mxu0 %vm795_vm2, %v2472_v19 }
0x15ff   : > { %3810 = vmatprep.mubr.msk.bf16.mxu0 %vm4111_vm1, %v4110_v26 }
0x16c5   : > { %v2465_v20 = vpop.f32.mrb[28].mxu1 }
0x16c6   : > { %v3796_v21 = vpop.f32.mrb[29].mxu1 }
0x16c7   : > { %v2468_v22 = vpop.f32.mrb[30].mxu1 }
0x16c8   : > { %v3797_v23 = vpop.f32.mrb[31].mxu1  ;;  %v3979_v22 = vld [vmem:[%s4842_s10 + $0x20] sm:$0xff]  }
0x16c9   : > { %v2416_v25 = vpop.f32.mrb[32].mxu0  ;;  %v3981_v23 = vld [vmem:[%s4842_s10 + $0x30] sm:$0xff]  }
0x16ca   : > { %v2466_v24 = vadd.f32 %v2465_v20, %v2416_v25  ;;  %v3790_v27 = vpop.f32.mrb[33].mxu0  ;;  %v3982_v25 = vld [vmem:[%s4842_s10 + $0x38] sm:$0xff]  }
0x16cb   : > { %v2419_v30 = vpop.f32.mrb[34].mxu0 }
0x16cc   : > { %v3791_v31 = vpop.f32.mrb[35].mxu0 }
0x16d1   : > { %v2545_v32 = vpop.f32.mrb[30].mxu0 }
0x16d2   : > { %v2546_v34 = vadd.f32 %v4359_v42, %v2545_v32  ;;  %v3802_v35 = vpop.f32.mrb[31].mxu0 }
0x16d4   : > { %v2549_v38 = vsel %vm871_vm3, %v2546_v34, -inf }
0x16d5   : > { %2550 = vmax.xlane.f32.xlu0 %v2549_v38  ;;  %v3525_v38 = vld [vmem:[%s4841_s9 + $0x1] ss:$0 sm:$0xff] }
0x16eb   : > { %2560 = vrot.lane.b32.xlu0 %v4565_v47, %s4890_s1  ;;  %s4119_s1 = smov [#allocation2]  }
0x16ec   : > { %s4049_s21 = sshll.u32 %s4119_s1, 4  ;;  %s4050_s21 = int_to_ptr.vmem [resolvable:$false] %s4049_s21 }
0x16ed   : > { %s4051_s23 = scalar_lea.vmem %s4050_s21, 32 }
0x16ef   : > { %2687 = vrot.lane.b32.xlu0 %v4573_v29, %s4891_s28 }
0x1762   : > { %v2551_v39 = vpop.xlane.xlu0 %2550 }
0x1763   : > { %v2552_v43 = vsub.f32 %v2546_v34, %v2551_v39  ;;  %v3524_v34 = vld [vmem:[%s4840_s8 + $0x1] ss:$0 sm:$0xff] }
0x1765   : > { %v2553_v44 = vmul.f32 1.442695, %v2552_v43 }
0x1766   : > { %v2561_v45 = vpop.permute.xlu0 %2560 }
0x1767   : > { %4031 = vpow2.f32 %v2553_v44  ;;  %3804 = vmatpush3.msra.mxu1 %v2561_v45  ;;  %v3984_v45 = vld [vmem:[%s4844_s12 + $0x48] sm:$0xff]  }
0x1768   : > { %3814 = vmatprep.subr.mxu1 %v4110_v26 }
0x176a   : > { %v2688_v48 = vpop.permute.xlu0 %2687 }
0x1771   : > { %v4032_v33 = vpop.eup %4031 }
0x1772   : > { %v2555_v40 = vsel %vm871_vm3, %v4032_v33, 0.0 }
0x1773   : > { %2556 = vadd.xlane.f32.xlu1 %v2555_v40  ;;  %v3986_v40 = vld [vmem:[%s4844_s12 + $0x58] sm:$0xff]  }
0x1784   : > { %2689 = vrot.lane.b32.xlu1 %v4563_v46, %s4892_s24  ;;  %v3977_v46 = vld [vmem:[%s4838_s6 + $0x30] sm:$0xff]  }
0x1785   : > { %3809 = vmatpush3.bf16.msra.mxu0 %v3977_v46 }
0x1786   : > { %3824 = vmatprep.subr.bf16.mxu0 %v4110_v26 }
0x1800   : > { %v2557_v15 = vpop.xlane.xlu1 %2556 }
0x1801   : > { %4033 = vrcp.f32 %v2557_v15  ;;  %v3987_v15 = vld [vmem:[%s4844_s12 + $0x60] sm:$0xff]  }
0x1804   : > { %v2690_v29 = vpop.permute.xlu1 %2689 }
0x180b   : > { %v4034_v28 = vpop.eup %4033 }
0x180c   : > { %v2559_v37 = vmul.f32 %v4034_v28, %v4032_v33  ;;  %v3985_v33 = vld [vmem:[%s4844_s12 + $0x50] sm:$0xff]   ;;  %v3988_v28 = vld [vmem:[%s4844_s12 + $0x68] sm:$0xff]  }
0x180e   : > { %3806 = vmatmul.mubr.msk.f32.vlgmr.msra.gmra.mrb[26].mxu1 %vm871_vm3, %v2559_v37  ;;  %v3989_v37 = vld [vmem:[%s4844_s12 + $0x70] sm:$0xff]  }
0x180f   : > { %3815 = vmatpush3.xpose.msk.msra.mxu1 %vm795_vm2, %v2690_v29  ;;  %3816 = vmatprep.mubr.msk.f32.mxu1 %vm4111_vm1, %v4110_v26  ;;  %v3990_v29 = vld [vmem:[%s4844_s12 + $0x78] sm:$0xff]  }
0x1810   : > { %3819 = vmatprep.subr.mxu1 %v4110_v26 }
0x1812   : > { %3817 = vmatmul.mubr.msk.f32.vlgmr.msra.gmra.mrb[32].mxu1 %vm795_vm2, %v2688_v48  ;;  %v3535_v48 = vld [vmem:[%s4843_s11 + $0x1] ss:$0 sm:$0xff] }
0x1813   : > { %3821 = vmatprep.mubr.msk.f32.mxu1 %vm4111_vm1, %v4110_v26 }
0x18e1   : > { %v2632_v49 = vpop.f32.mrb[26].mxu1 }
0x18e2   : > { %v2636_v50 = vpack.c.bf16 %v2632_v49, %v2632_v49  ;;  %v3807_v51 = vpop.f32.mrb[27].mxu1 }
0x18e4   : > { %3811 = vmatmul.mubr.msk.bf16.vlgmr.msra.gmra.mrb[36].mxu0 %vm795_vm2, %v2636_v50 }
0x18e5   : > { %v2761_v52 = vpop.f32.mrb[32].mxu1  ;;  %3826 = vmatprep.mubr.msk.bf16.mxu0 %vm4111_vm1, %v4110_v26 }
0x18e6   : > { %v2762_v53 = vadd.f32 %v4359_v42, %v2761_v52  ;;  %v3818_v54 = vpop.f32.mrb[33].mxu1 }
0x18e8   : > { %v2765_v55 = vsel %vm871_vm3, %v2762_v53, -inf }
0x18e9   : > { %2766 = vmax.xlane.f32.xlu1 %v2765_v55 }
0x1976   : > { %v2767_v56 = vpop.xlane.xlu1 %2766 }
0x1977   : > { %v2768_v57 = vsub.f32 %v2762_v53, %v2767_v56 }
0x1979   : > { %v2769_v58 = vmul.f32 1.442695, %v2768_v57 }
0x197b   : > { %4035 = vpow2.f32 %v2769_v58 }
0x1985   : > { %v4036_v59 = vpop.eup %4035 }
0x1986   : > { %v2771_v60 = vsel %vm871_vm3, %v4036_v59, 0.0 }
0x1987   : > { %2772 = vadd.xlane.f32.xlu0 %v2771_v60 }
0x199d   : > { %2776 = vrot.lane.b32.xlu0 %v4565_v47, %s4891_s28  ;;  %v3978_v47 = vld [vmem:[%s4838_s6 + $0x38] sm:$0xff]   ;;  %s630_s28 = scalar_lea.vmem [#allocation2], %s629_s29 }
0x199e   : > { %3825 = vmatpush3.bf16.msra.mxu0 %v3978_v47  ;;  %s3353_s24 = sshll.u32 %s630_s28, 4  ;;  %s4792_s24 = int_to_ptr.vmem [resolvable:$true] %s3353_s24 }
0x199f   : > { %3842 = vmatprep.subr.bf16.mxu0 %v4110_v26  ;;  %s4045_s2 = scalar_lea.vmem %s4792_s24, 16  ;;  %p4052_p0 = scmp.lt.s32.totalorder %s4792_s24, %s4050_s21 }
0x19a0   : > { %p4046_p11 = scmp.ne.s32.totalorder %s4792_s24, %s4045_s2  ;;  %p4053_p1 = scmp.lt.s32.totalorder %s4051_s23, %s4045_s2 }
0x19a2   : > { %p4047_p12 = pnand %p4046_p11, %p4263_p5  ;;  %p4054_p2 = por %p4053_p1, %p4052_p0 }
0x19a4   : > { %p4048_p13 = pneg %p4047_p12 }
0x19a6   : > { %p4055_p3 = pnand %p4054_p2, %p4048_p13 }
0x19b7   : > { %v2680_v61 = vpop.f32.mrb[36].mxu0 }
0x19b8   : > { %v2686_v62 = vadd.f32 %v2680_v61, %v2466_v24  ;;  %v3812_v63 = vpop.f32.mrb[37].mxu0  ;;  %v3983_v24 = vld [vmem:[%s4844_s12 + $0x40] sm:$0xff]  }
0x19b9   : > { %v2683_v0 = vpop.f32.mrb[38].mxu0  ;;  %v3558_v63 = vld [vmem:[%s4845_s13 + $0x1] ss:$0 sm:$0xff] }
0x19ba   : > { %v3813_v42 = vpop.f32.mrb[39].mxu0 }
0x1a14   : > { %v2773_v1 = vpop.xlane.xlu0 %2772 }
0x1a15   : > { %4037 = vrcp.f32 %v2773_v1 }
0x1a18   : > { %v2777_v2 = vpop.permute.xlu0 %2776 }
0x1a19   : > { %3820 = vmatpush3.msra.mxu1 %v2777_v2 }
0x1a1a   : > { %3830 = vmatprep.subr.bf16.mxu1 %v4110_v26 }
0x1a1f   : > { %v4038_v3 = vpop.eup %4037 }
0x1a20   : > { %v2775_v4 = vmul.f32 %v4038_v3, %v4036_v59 }
0x1a22   : > { %3822 = vmatmul.mubr.msk.f32.vlgmr.msra.gmra.mrb[34].mxu1 %vm871_vm3, %v2775_v4 }
0x1a23   : > { %3838 = vmatprep.mubr.msk.bf16.mxu1 %vm4111_vm1, %v4110_v26  ;;  %3831 = vmatpush3.bf16.msra.mxu1 %v3979_v22 }
0x1a24   : > { %3832 = vmatprep.subr.bf16.mxu1 %v4110_v26 }
0x1af5   : > { %v2848_v5 = vpop.f32.mrb[34].mxu1 }
0x1af6   : > { %v2852_v41 = vpack.c.bf16 %v2848_v5, %v2848_v5  ;;  %v3823_v6 = vpop.f32.mrb[35].mxu1 }
0x1af8   : > { %3827 = vmatmul.mubr.msk.bf16.vlgmr.msra.gmra.mrb[40].mxu0 %vm795_vm2, %v2852_v41 }
0x1af9   : > { %3858 = vmatprep.mubr.msk.bf16.mxu0 %vm4111_vm1, %v4110_v26  ;;  %3843 = vmatpush3.bf16.msra.mxu0 %v3983_v24  ;;  %v3997_v24 = vld [vmem:[%s4850_s18 + $0x10] sm:$0xff]  }
0x1afa   : > { %3844 = vmatprep.subr.bf16.mxu0 %v4110_v26 }
0x1afd   : > { %3845 = vmatpush3.bf16.msra.mxu0 %v3984_v45 }
0x1afe   : > { %3846 = vmatprep.subr.bf16.mxu0 %v4110_v26 }
0x1b01   : > { %3847 = vmatpush3.bf16.msra.mxu0 %v3985_v33 }
0x1b02   : > { %3848 = vmatprep.subr.bf16.mxu0 %v4110_v26 }
0x1b05   : > { %3849 = vmatpush3.bf16.msra.mxu0 %v3986_v40 }
0x1b06   : > { %3850 = vmatprep.subr.bf16.mxu0 %v4110_v26 }
0x1b09   : > { %3851 = vmatpush3.bf16.msra.mxu0 %v3987_v15 }
0x1b0a   : > { %3852 = vmatprep.subr.bf16.mxu0 %v4110_v26 }
0x1b0d   : > { %3853 = vmatpush3.bf16.msra.mxu0 %v3988_v28 }
0x1b0e   : > { %3854 = vmatprep.subr.bf16.mxu0 %v4110_v26 }
0x1b11   : > { %3855 = vmatpush3.bf16.msra.mxu0 %v3989_v37 }
0x1b12   : > { %3856 = vmatprep.subr.bf16.mxu0 %v4110_v26 }
0x1b15   : > { %3857 = vmatpush3.bf16.msra.mxu0 %v3990_v29 }
0x1bcb   : > { %v2896_v7 = vpop.f32.mrb[40].mxu0 }
0x1bcc   : > { %v2902_v9 = vadd.f32 %v2896_v7, %v2686_v62  ;;  %v3828_v10 = vpop.f32.mrb[41].mxu0 }
0x1bcd   : > { %v2899_v11 = vpop.f32.mrb[42].mxu0  ;;  %v3992_v10 = vld [vmem:[%s4848_s16 + $0x8] sm:$0xff]  }
0x1bce   : > { %v2911_v12 = vadd.f32 %v3521_v8, %v2902_v9  ;;  %v3829_v13 = vpop.f32.mrb[43].mxu0  ;;  %v3991_v9 = vld [vmem:[%s4848_s16] sm:$0xff]   ;;  %v3993_v11 = vld [vmem:[%s4848_s16 + $0x10] sm:$0xff]  }
0x1bd0   : > { %v2912_v14 = vadd.f32 %v2911_v12, %v4549_v36  ;;  %v3980_v36 = vld [vmem:[%s4842_s10 + $0x28] sm:$0xff]   ;;  %v3994_v12 = vld [vmem:[%s4848_s16 + $0x18] sm:$0xff]  }
0x1bd1   : > { %3833 = vmatpush3.bf16.msra.mxu1 %v3980_v36  ;;  %v3995_v36 = vld [vmem:[%s4850_s18] sm:$0xff]  }
0x1bd2   : > { %v2917_v16 = vsel %vm642_vm0, %v2912_v14, 0.0  ;;  %3834 = vmatprep.subr.bf16.mxu1 %v4110_v26 }
0x1bd3   : > { %2918 = vadd.xlane.f32.xlu1 %v2917_v16 }
0x1bd5   : > { %3835 = vmatpush3.bf16.msra.mxu1 %v3981_v23 }
0x1bd6   : > { %3836 = vmatprep.subr.bf16.mxu1 %v4110_v26 }
0x1bd9   : > { %3837 = vmatpush3.bf16.msra.mxu1 %v3982_v25  ;;  %v3996_v25 = vld [vmem:[%s4850_s18 + $0x8] sm:$0xff]  }
0x1bda   : > { %3862 = vmatprep.subr.bf16.mxu1 %v4110_v26 }
0x1c60   : > { %v2919_v17 = vpop.xlane.xlu1 %2918 }
0x1c61   : > { %v2920_v18 = vmul.f32 0.015625, %v2919_v17 }
0x1c63   : > { %v2921_v19 = vsub.f32 %v2912_v14, %v2920_v18  ;;  %v3569_v18 = vld [vmem:[%s4846_s14 + $0x1] ss:$0 sm:$0xff] }
0x1c65   : > { %v2922_v20 = vmul.f32 %v2921_v19, %v2921_v19 }
0x1c67   : > { %v2923_v21 = vsel %vm642_vm0, %v2922_v20, 0.0  ;;  %v3570_v20 = vld [vmem:[%s4847_s15 + $0x1] ss:$0 sm:$0xff] }
0x1c68   : > { %2924 = vadd.xlane.f32.xlu1 %v2923_v21 }
0x1cf5   : > { %v2925_v27 = vpop.xlane.xlu1 %2924 }
0x1cf6   : > { %v2926_v30 = vmul.f32 0.015625, %v2925_v27  ;;  %v3998_v27 = vld [vmem:[%s4850_s18 + $0x18] sm:$0xff]  }
0x1cf8   : > { %v2927_v31 = vadd.f32 1e-05, %v2926_v30  ;;  %v3193_v30 = vld [vmem:[%s4849_s17] sm:$0x1] }
0x1cfa   : > { %4039 = vrsqrt.f32 %v2927_v31 }
0x1d04   : > { %v4040_v32 = vpop.eup %4039 }
0x1d05   : > { %v2929_v35 = vmul.f32 %v4040_v32, %v2921_v19 }
0x1d07   : > { %v2936_v39 = vmul.f32 %v3524_v34, %v2929_v35 }
0x1d09   : > { %v2943_v43 = vadd.f32 %v3525_v38, %v2936_v39 }
0x1d0b   : > { %v2953_v44 = vpack.c.bf16 %v2943_v43, %v2943_v43 }
0x1d0d   : > { %3839 = vmatmul.mubr.msk.bf16.vlgmr.msra.gmra.mrb[36].mxu1 %vm642_vm0, %v2953_v44 }
0x1d0e   : > { %3870 = vmatprep.mubr.msk.bf16.mxu1 %vm4111_vm1, %v4110_v26  ;;  %3863 = vmatpush3.bf16.msra.mxu1 %v3991_v9 }
0x1d0f   : > { %3864 = vmatprep.subr.bf16.mxu1 %v4110_v26 }
0x1d12   : > { %3865 = vmatpush3.bf16.msra.mxu1 %v3992_v10 }
0x1d13   : > { %3866 = vmatprep.subr.bf16.mxu1 %v4110_v26 }
0x1d16   : > { %3867 = vmatpush3.bf16.msra.mxu1 %v3993_v11 }
0x1d17   : > { %3868 = vmatprep.subr.bf16.mxu1 %v4110_v26 }
0x1d1a   : > { %3869 = vmatpush3.bf16.msra.mxu1 %v3994_v12 }
0x1d1b   : > { %3874 = vmatprep.subr.bf16.mxu1 %v4110_v26 }
0x1de0   : > { %v3023_v46 = vpop.f32.mrb[36].mxu1 }
0x1de1   : > { %v3024_v49 = vadd.f32 %v3535_v48, %v3023_v46  ;;  %v3840_v50 = vpop.f32.mrb[37].mxu1 }
0x1de2   : > { %v3026_v51 = vpop.f32.mrb[38].mxu1 }
0x1de3   : > { %v3030_v52 = vmul.f32 0.044715, %v3024_v49  ;;  %v3841_v53 = vpop.f32.mrb[39].mxu1  ;;  %v3029_v59 = vmul.f32 0.5, %v3024_v49 }
0x1de5   : > { %v3031_v54 = vmul.f32 %v3030_v52, %v3024_v49 }
0x1de7   : > { %v3032_v55 = vmul.f32 %v3031_v54, %v3024_v49 }
0x1de9   : > { %v3033_v56 = vadd.f32 %v3032_v55, %v3024_v49 }
0x1deb   : > { %v3034_v57 = vmul.f32 0.7978846, %v3033_v56 }
0x1ded   : > { %4041 = vtanh.f32 %v3034_v57 }
0x1df7   : > { %v4042_v58 = vpop.eup %4041 }
0x1df8   : > { %v3036_v60 = vadd.f32 1.0, %v4042_v58 }
0x1dfa   : > { %v3037_v61 = vmul.f32 %v3036_v60, %v3029_v59 }
0x1dfc   : > { %v3055_v62 = vpack.c.bf16 %v3037_v61, %v3037_v61 }
0x1dfe   : > { %3859 = vmatmul.mubr.bf16.vlgmr.msra.gmra.mrb[44].mxu0 %v3055_v62 }
0x1ed1   : > { %v3146_v0 = vpop.f32.mrb[44].mxu0 }
0x1ed2   : > { %v3147_v42 = vadd.f32 %v3558_v63, %v3146_v0  ;;  %v3860_v1 = vpop.f32.mrb[45].mxu0 }
0x1ed3   : > { %v3149_v2 = vpop.f32.mrb[46].mxu0 }
0x1ed4   : > { %v3861_v3 = vpop.f32.mrb[47].mxu0  ;;  %v3152_v4 = vadd.f32 %v3147_v42, %v2943_v43 }
0x1ed6   : > { %v3157_v47 = vsel %vm642_vm0, %v3152_v4, 0.0 }
0x1ed7   : > { %3158 = vadd.xlane.f32.xlu1 %v3157_v47 }
0x1f64   : > { %v3159_v5 = vpop.xlane.xlu1 %3158 }
0x1f65   : > { %v3160_v41 = vmul.f32 0.015625, %v3159_v5 }
0x1f67   : > { %v3161_v6 = vsub.f32 %v3152_v4, %v3160_v41 }
0x1f69   : > { %v3162_v7 = vmul.f32 %v3161_v6, %v3161_v6 }
0x1f6b   : > { %v3163_v8 = vsel %vm642_vm0, %v3162_v7, 0.0 }
0x1f6c   : > { %3164 = vadd.xlane.f32.xlu1 %v3163_v8 }
0x1ff9   : > { %v3165_v13 = vpop.xlane.xlu1 %3164 }
0x1ffa   : > { %v3166_v14 = vmul.f32 0.015625, %v3165_v13 }
0x1ffc   : > { %v3167_v16 = vadd.f32 1e-05, %v3166_v14 }
0x1ffe   : > { %4043 = vrsqrt.f32 %v3167_v16 }
0x2008   : > { %v4044_v17 = vpop.eup %4043 }
0x2009   : > { %v3169_v19 = vmul.f32 %v4044_v17, %v3161_v6 }
0x200b   : > { %v3176_v21 = vmul.f32 %v3569_v18, %v3169_v19 }
0x200d   : > { %v3183_v22 = vadd.f32 %v3570_v20, %v3176_v21 }
0x200f   : > { %v3192_v23 = vpack.c.bf16 %v3183_v22, %v3183_v22 }
0x2011   : > { %3871 = vmatmul.mubr.msk.bf16.vlgmr.msra.gmra.mrb[40].mxu1 %vm642_vm0, %v3192_v23 }
0x2012   : > { %3875 = vmatpush3.bf16.msra.mxu1 %v3995_v36  ;;  %3882 = vmatprep.mubr.msk.bf16.mxu1 %vm4111_vm1, %v4110_v26 }
0x2013   : > { %3876 = vmatprep.subr.bf16.mxu1 %v4110_v26 }
0x2016   : > { %3877 = vmatpush3.bf16.msra.mxu1 %v3996_v25 }
0x2017   : > { %3878 = vmatprep.subr.bf16.mxu1 %v4110_v26 }
0x201a   : > { %3879 = vmatpush3.bf16.msra.mxu1 %v3997_v24 }
0x201b   : > { %3880 = vmatprep.subr.bf16.mxu1 %v4110_v26  ;;  %v3271_v26 = vld [vmem:[%s4851_s19] sm:$0x1] }
0x201e   : > { %3881 = vmatpush3.bf16.msra.mxu1 %v3998_v27 }
0x20e4   : > { %v3255_v31 = vpop.f32.mrb[40].mxu1 }
0x20e5   : > { %v3256_v32 = vadd.f32 %v3255_v31, %v3193_v30  ;;  %v3872_v34 = vpop.f32.mrb[41].mxu1 }
0x20e6   : > { %v3258_v35 = vpop.f32.mrb[42].mxu1 }
0x20e7   : > { %v3261_v38 = vmax.f32 %v3256_v32, 0.0  ;;  %v3873_v39 = vpop.f32.mrb[43].mxu1 }
0x20e9   : > { %v3270_v43 = vpack.c.bf16 %v3261_v38, %v3261_v38 }
0x20eb   : > { %3883 = vmatmul.mubr.msk.bf16.vlgmr.msra.gmra.mrb[44].mxu1 %vm642_vm0, %v3270_v43 }
0x21be   : > { %v3333_v44 = vpop.f32.mrb[44].mxu1 }
0x21bf   : > { %v3334_v45 = vadd.f32 %v3333_v44, %v3271_v26  ;;  %v3884_v33 = vpop.f32.mrb[45].mxu1 }
0x21c0   : > { %v3336_v40 = vpop.f32.mrb[46].mxu1 }
0x21c1   : > { %3339 = vst [vmem:[%s630_s28] sm:$0x1] %v3334_v45  ;;  %v3885_v15 = vpop.f32.mrb[47].mxu1 }
0x21c2   : > { %4058 = shalt.err (!%p4055_p3)
}
0x21c3   : > { %s4059_s29 = scalar_lea.hbm %s4790_s27, 16  ;;  %s4063_s25 = scalar_lea.hbm %s4852_s20, 32 }
0x21c4   : > { %p4060_p4 = scmp.ne.s32.totalorder %s4790_s27, %s4059_s29  ;;  %p4064_p9 = scmp.lt.u32.totalorder %s4790_s27, %s4852_s20 }
0x21c5   : > { %p4065_p10 = scmp.lt.u32.totalorder %s4063_s25, %s4059_s29  ;;  %p4067_p12 = scmp.lt.u32.totalorder %s4059_s29, %s4790_s27 }
0x21c6   : > { %p4061_p7 = pnand %p4060_p4, %p4263_p5 }
0x21c7   : > { %p4066_p11 = por %p4065_p10, %p4064_p9 }
0x21c8   : > { %p4062_p8 = pneg %p4061_p7 }
0x21c9   : > { %p4068_p13 = por %p4067_p12, %p4066_p11 }
0x21cb   : > { %p4069_p0 = pnand %p4068_p13, %p4062_p8 }
0x21cd   : > { %4072 = shalt.err (!%p4069_p0)
}
0x21ce   : > { %3886 = dma.vmem_to_hbm [thread:$0]  (%p4263_p5), %s4792_s24, 16, %s4790_s27, %s3341_s0  }
0x21cf PF: > { %s4893_s2 = sld [smem:[#allocation7_spill]]  ;;  %s4894_s21 = sld [smem:[#allocation5_spill]] }
0x21d5   : > { %p3892_p1 = scmp.ge.s32.totalorder %s4893_s2, 2  ;;  %s3365_s30 = sand.u32 1, %s4894_s21  }
0x21d6   : > { %s3366_s28 = scalar_lea.sflag [#allocation3], %s3365_s30 }
0x21d7   : > { %p3889_p2 = pnand %p3892_p1, %p4267_p6 }
0x21d9   : > { %4090 = dma.done.wait (!%p3889_p2), %s3366_s28, 16  }
0x21da   : > { %4092 = vsyncadd (!%p3889_p2), %s3366_s28, 4294967280  ;;  %s4896_s24 = sld [smem:[#allocation8_spill]]  ;;  %s4897_s29 = sld [smem:[#allocation6_spill]] }
0x21db   : > { %s4898_s23 = sld [smem:[#allocation9_spill]]  ;;  %s4899_s1 = smov %s4099_s22 }
0x21e0   : > { %p30_p3 = scmp.ge.s32.totalorder %s4896_s24, 4   ;;  %s4900_s22 = smov %s4897_s29 }
0x21e2   :  { %32 = sbr.rel (!%p30_p3) target bundleno = 9 (0x9), region = 150 }
0x21e9   :  { %3370 = vsyncpa [#allocation3], 1 }
0x21ea   :  { %3372 = vsyncpa [#allocation3 + $0x1], 1 }

</bundles_post_ra>
